<compile_context>
chip_gen: v6e
topology: v6e:2x2x1
jax: 0.10.0
libtpu: 0.0.40
codegen_flags: <defaults>
</compile_context>

<pallas_src>
import jax
import jax.numpy as jnp
from jax.experimental import pallas as pl
from jax.experimental.pallas import tpu as pltpu

EPS = 1e-6


def _tail_kernel(x_ref, w_ref, b_ref, o_ref):
    # x_ref: (1, TS, D)     current sequence tile of one batch element
    # w_ref: (1, D, OUT)    per-batch fused projection weight ((1+scale) folded in)
    # b_ref: (1, 1, OUT)    per-batch fused bias (shift @ Wt + b_proj), f32
    # o_ref: (1, TS, OUT)   output tile
    x = x_ref[0].astype(jnp.float32)                       # (TS, D)

    # LayerNorm over the hidden dim (no learnable affine), biased variance.
    mean = jnp.mean(x, axis=-1, keepdims=True)             # (TS, 1)
    xc = x - mean
    var = jnp.mean(xc * xc, axis=-1, keepdims=True)        # (TS, 1)
    x_hat = xc * jax.lax.rsqrt(var + EPS)                  # (TS, D)

    # Fused projection on the MXU: modulation is already folded into w/b.
    w = w_ref[0]                                           # (D, OUT), compute dtype
    out = jnp.dot(x_hat.astype(w.dtype), w,
                  preferred_element_type=jnp.float32)      # (TS, OUT) f32
    out = out + b_ref[0]                                   # broadcast (1, OUT) f32

    o_ref[0] = out.astype(o_ref.dtype)


def _pick_tile(S, tile_s):
    """Largest divisor of S that is <= tile_s and a multiple of 8 (sublanes)."""
    if S <= tile_s:
        return S
    for t in range(min(tile_s, S), 0, -1):
        if S % t == 0 and t % 8 == 0:
            return t
    return S  # fall back to a single full-sequence tile


def tail_pallas(hidden_states, temb, params, *, tile_s=512):
    """hidden_states: (B, S, D), temb: (B, D) -> (B, S, OUT)."""
    B, S, D = hidden_states.shape
    w_mod, b_mod = params["norm_linear_w"], params["norm_linear_b"]   # (2D, D), (2D,)
    w_proj, b_proj = params["proj_w"], params["proj_b"]               # (OUT, D), (OUT,)
    OUT = w_proj.shape[0]

    # --- glue: conditioning embedding (tiny matmul, kept in f32) ------------
    emb = jax.nn.silu(temb.astype(jnp.float32)) @ w_mod.T.astype(jnp.float32)
    emb = emb + b_mod.astype(jnp.float32)                              # (B, 2D)
    scale, shift = emb[:, :D], emb[:, D:]                              # (B, D) f32

    # Fold the adaptive modulation into a per-batch projection weight / bias.
    w_proj_t = jnp.transpose(w_proj).astype(jnp.float32)               # (D, OUT)
    w_fused = (1.0 + scale)[:, :, None] * w_proj_t[None, :, :]         # (B, D, OUT) f32
    b_fused = shift @ w_proj_t + b_proj.astype(jnp.float32)            # (B, OUT)  f32
    b_fused = b_fused.reshape(B, 1, OUT)                               # (B, 1, OUT)

    # MXU compute dtype: native bf16 path when activations are bf16, else f32.
    mm_dtype = jnp.bfloat16 if hidden_states.dtype == jnp.bfloat16 else jnp.float32
    w_fused = w_fused.astype(mm_dtype)

    ts = _pick_tile(S, tile_s)
    grid = (S // ts, B)   # sequence axis leading -> megacore-shardable when B == 1

    out = pl.pallas_call(
        _tail_kernel,
        out_shape=jax.ShapeDtypeStruct((B, S, OUT), hidden_states.dtype),
        grid_spec=pltpu.PrefetchScalarGridSpec(
            num_scalar_prefetch=0,
            grid=grid,
            in_specs=[
                pl.BlockSpec((1, ts, D), lambda s, b: (b, s, 0)),      # x tile
                pl.BlockSpec((1, D, OUT), lambda s, b: (b, 0, 0)),     # fused weight
                pl.BlockSpec((1, 1, OUT), lambda s, b: (b, 0, 0)),     # fused bias
            ],
            out_specs=pl.BlockSpec((1, ts, OUT), lambda s, b: (b, s, 0)),
        ),
        compiler_params=pltpu.CompilerParams(
            dimension_semantics=("parallel", "parallel"),
            vmem_limit_bytes=32 * 1024 * 1024,
        ),
    )(hidden_states, w_fused, b_fused)
    return out


def tail_reference(hidden_states, temb, params):
    """Plain-JAX reference matching the PyTorch semantics (unfused form)."""
    D = hidden_states.shape[-1]
    x = hidden_states.astype(jnp.float32)
    emb = jax.nn.silu(temb.astype(jnp.float32)) @ params["norm_linear_w"].T
    emb = emb + params["norm_linear_b"]
    scale, shift = emb[:, :D], emb[:, D:]
    mean = jnp.mean(x, axis=-1, keepdims=True)
    var = jnp.mean((x - mean) ** 2, axis=-1, keepdims=True)
    x_hat = (x - mean) * jax.lax.rsqrt(var + EPS)
    y = x_hat * (1.0 + scale)[:, None, :] + shift[:, None, :]
    out = y @ params["proj_w"].T + params["proj_b"]
    return out.astype(hidden_states.dtype)


if __name__ == "__main__":
    # Small shapes consistent with the module (real FLUX: B=1, S=4096, D=3072, OUT=64)
    B, S, D, OUT = 2, 256, 256, 64

    key = jax.random.PRNGKey(0)
    k_h, k_t, k_w1, k_b1, k_w2, k_b2 = jax.random.split(key, 6)

    hidden_states = jax.random.normal(k_h, (B, S, D), dtype=jnp.float32)
    temb = jax.random.normal(k_t, (B, D), dtype=jnp.float32)

    # Deterministic synthetic parameters (shapes from AdaLayerNormContinuous + proj_out)
    params = {
        "norm_linear_w": jax.random.normal(k_w1, (2 * D, D), dtype=jnp.float32) * 0.02,
        "norm_linear_b": jax.random.normal(k_b1, (2 * D,), dtype=jnp.float32) * 0.02,
        "proj_w": jax.random.normal(k_w2, (OUT, D), dtype=jnp.float32) * 0.02,
        "proj_b": jax.random.normal(k_b2, (OUT,), dtype=jnp.float32) * 0.02,
    }

    out = tail_pallas(hidden_states, temb, params)
    out = jax.block_until_ready(out)

    ref = tail_reference(hidden_states, temb, params)
    assert out.shape == (B, S, OUT)
    assert jnp.allclose(out, ref, atol=1e-3, rtol=1e-3), "mismatch vs reference"

    print("KERNEL_OK")
</pallas_src>

<mosaic_0001>
module attributes {stable_mosaic.version = 11 : i64} {
  func.func @_tail_kernel(%arg0: i32, %arg1: i32, %arg2: memref<1x256x256xf32, #tpu.memory_space<vmem>>, %arg3: memref<1x256x64xf32, #tpu.memory_space<vmem>>, %arg4: memref<1x1x64xf32, #tpu.memory_space<vmem>>, %arg5: memref<1x256x64xf32, #tpu.memory_space<vmem>>) attributes {dimension_semantics = [#tpu.dimension_semantics<parallel>, #tpu.dimension_semantics<parallel>], iteration_bounds = array<i64: 1, 2>, scalar_prefetch = 0 : i64, scratch_operands = 0 : i64, tpu.core_type = #tpu.core_type<tc>, window_params = [{transform_indices = @transform_0, window_bounds = array<i64: 1, 256, 256>}, {transform_indices = @transform_1, window_bounds = array<i64: 1, 256, 64>}, {transform_indices = @transform_2, window_bounds = array<i64: 1, 1, 64>}, {transform_indices = @transform_3, window_bounds = array<i64: 1, 256, 64>}]} {
    %c0 = arith.constant 0 : index
    %c0_0 = arith.constant 0 : index
    %c0_1 = arith.constant 0 : index
    %0 = vector.load %arg2[%c0, %c0_0, %c0_1] : memref<1x256x256xf32, #tpu.memory_space<vmem>>, vector<1x256x256xf32>
    %1 = vector.shape_cast %0 : vector<1x256x256xf32> to vector<256x256xf32>
    %cst = arith.constant dense<0.000000e+00> : vector<256xf32>
    %2 = vector.multi_reduction <add>, %1, %cst [1] : vector<256x256xf32> to vector<256xf32>
    %3 = vector.shape_cast %2 : vector<256xf32> to vector<256x1xf32>
    %cst_2 = arith.constant 2.560000e+02 : f32
    %4 = vector.broadcast %cst_2 : f32 to vector<256x1xf32>
    %5 = arith.divf %3, %4 : vector<256x1xf32>
    %6 = vector.broadcast %5 : vector<256x1xf32> to vector<256x256xf32>
    %7 = arith.subf %1, %6 : vector<256x256xf32>
    %8 = arith.mulf %7, %7 : vector<256x256xf32>
    %cst_3 = arith.constant dense<0.000000e+00> : vector<256xf32>
    %9 = vector.multi_reduction <add>, %8, %cst_3 [1] : vector<256x256xf32> to vector<256xf32>
    %10 = vector.shape_cast %9 : vector<256xf32> to vector<256x1xf32>
    %cst_4 = arith.constant 2.560000e+02 : f32
    %11 = vector.broadcast %cst_4 : f32 to vector<256x1xf32>
    %12 = arith.divf %10, %11 : vector<256x1xf32>
    %cst_5 = arith.constant 9.99999997E-7 : f32
    %13 = vector.broadcast %cst_5 : f32 to vector<256x1xf32>
    %14 = arith.addf %12, %13 : vector<256x1xf32>
    %15 = math.rsqrt %14 : vector<256x1xf32>
    %16 = vector.broadcast %15 : vector<256x1xf32> to vector<256x256xf32>
    %17 = arith.mulf %7, %16 : vector<256x256xf32>
    %c0_6 = arith.constant 0 : index
    %c0_7 = arith.constant 0 : index
    %c0_8 = arith.constant 0 : index
    %18 = vector.load %arg3[%c0_6, %c0_7, %c0_8] : memref<1x256x64xf32, #tpu.memory_space<vmem>>, vector<1x256x64xf32>
    %19 = vector.shape_cast %18 : vector<1x256x64xf32> to vector<256x64xf32>
    %cst_9 = arith.constant dense<0.000000e+00> : vector<256x64xf32>
    %20 = tpu.matmul %17, %19, %cst_9 {dimension_numbers = #tpu.dot_dimension_numbers<[1], [0], [0], [1], [0, 0, 1, 1], [], []>} : vector<256x256xf32>, vector<256x64xf32>, vector<256x64xf32> -> vector<256x64xf32>
    %c0_10 = arith.constant 0 : index
    %c0_11 = arith.constant 0 : index
    %c0_12 = arith.constant 0 : index
    %21 = vector.load %arg4[%c0_10, %c0_11, %c0_12] : memref<1x1x64xf32, #tpu.memory_space<vmem>>, vector<1x1x64xf32>
    %22 = vector.shape_cast %21 : vector<1x1x64xf32> to vector<1x64xf32>
    %23 = vector.broadcast %22 : vector<1x64xf32> to vector<256x64xf32>
    %24 = arith.addf %20, %23 : vector<256x64xf32>
    %c0_13 = arith.constant 0 : index
    %c0_14 = arith.constant 0 : index
    %c0_15 = arith.constant 0 : index
    %25 = vector.load %arg5[%c0_13, %c0_14, %c0_15] : memref<1x256x64xf32, #tpu.memory_space<vmem>>, vector<1x256x64xf32>
    %26 = vector.shape_cast %25 : vector<1x256x64xf32> to vector<256x64xf32>
    %27 = vector.shape_cast %24 : vector<256x64xf32> to vector<1x256x64xf32>
    tpu.vector_store %arg5[%c0_13, %c0_14, %c0_15], %27 {strides = array<i32>} : memref<1x256x64xf32, #tpu.memory_space<vmem>>, vector<1x256x64xf32>,
    return
  }
  func.func @transform_0(%arg0: i32, %arg1: i32) -> (i32, i32, i32) {
    %c0_i32 = arith.constant 0 : i32
    %c0_i32_0 = arith.constant 0 : i32
    return %arg1, %arg0, %c0_i32 : i32, i32, i32
  }
  func.func @transform_1(%arg0: i32, %arg1: i32) -> (i32, i32, i32) {
    %c0_i32 = arith.constant 0 : i32
    %c0_i32_0 = arith.constant 0 : i32
    %c0_i32_1 = arith.constant 0 : i32
    return %arg1, %c0_i32, %c0_i32_0 : i32, i32, i32
  }
  func.func @transform_2(%arg0: i32, %arg1: i32) -> (i32, i32, i32) {
    %c0_i32 = arith.constant 0 : i32
    %c0_i32_0 = arith.constant 0 : i32
    %c0_i32_1 = arith.constant 0 : i32
    return %arg1, %c0_i32, %c0_i32_0 : i32, i32, i32
  }
  func.func @transform_3(%arg0: i32, %arg1: i32) -> (i32, i32, i32) {
    %c0_i32 = arith.constant 0 : i32
    %c0_i32_0 = arith.constant 0 : i32
    return %arg1, %arg0, %c0_i32 : i32, i32, i32
  }
}

</mosaic_0001>

<bundles_post_ra>
// kernel: tpu_custom_call.1
= control target key start
LH: loop header
LB: loop body
LE: loop exit
PB: predicated region body
PF: predicated region fallthrough
CT: control target
= control target key end

     0   :  { %8 = vsyncpa [#allocation3], 0  ;;  %s2503_s0 = inlined_call_operand.hbm [shape: f32[2,256,256], index: 0, kind: input, shape index: {}]   ;;  %s2504_s1 = inlined_call_operand.vmem [shape: f32[2,256,64], index: 1, kind: input, shape index: {}]   ;;  %s2505_s2 = inlined_call_operand.vmem [shape: f32[2,1,64], index: 2, kind: input, shape index: {}]   ;;  %s2506_s3 = inlined_call_operand.vmem [shape: f32[2,256,64], index: 3, kind: output, shape index: {}]  }
   0x1   :  { %10 = vsyncpa [#allocation3 + $0x1], 0  ;;  %s1553_s12 = smov 0   ;;  %s1555_s13 = smov 0  }
   0x2   :  { %s1557_s14 = smov 0   ;;  %s1559_s15 = smov 0  }
   0x3   :  { %s1561_s16 = smov 0   ;;  %s1563_s17 = smov 0  }
   0x4 LB: > { %s1244_s18 = sadd.s32 4294967295, %s1527_s17   ;;  %s25_s19 = sadd.s32 1, %s1523_s16  ;;  %s1527_s17 = sphi %s1563_s17, %s16_s17   ;;  %s1523_s16 = sphi %s1561_s16, %s2613_s16   ;;  %s1519_s15 = sphi %s1559_s15, %s2612_s15   ;;  %s1515_s14 = sphi %s1557_s14, %s2611_s14   ;;  %s1511_s13 = sphi %s1555_s13, %s2610_s13   ;;  %s1507_s12 = sphi %s1553_s12, %s2609_s12  }
   0x5   : > { %p26_p0 = scmp.ge.s32.totalorder %s25_s19, 2  ;;  %s37_s20 = sadd.s32 1, %s1515_s14 }
   0x6   : > { %p44_p1 = scmp.ne.s32.totalorder %s1515_s14, %s1511_s13  ;;  %p45_p2 = scmp.eq.s32.totalorder %s1527_s17, 0 }
   0x7   : > { %s2615_s19 = smov (%p26_p0, %s25_s19), 0  ;;  %p50_p4 = scmp.ne.s32.totalorder %s1511_s13, %s1507_s12 }
   0x8   : > { %p1589_p3 = por %p45_p2, %p44_p1  ;;  %s32_s22 = ssub.s32 %s1523_s16, %s2615_s19 }
   0x9   : > { %p51_p5 = scmp.eq.s32.totalorder %s1244_s18, 0  ;;  %p35_p6 = scmp.eq.s32.totalorder %s32_s22, 0 }
   0xa   : > { %p1333_p8 = scmp.lt.s32.totalorder %s1527_s17, 2  ;;  %s154_s25 = sand.u32 1, %s1515_s14  }
   0xb   : > { %p1596_p7 = por %p51_p5, %p50_p4  ;;  %s1260_s26 = sshll.u32 %s1523_s16, 13 }
   0xc   : > { %s1602_s24 = scalar_select %p35_p6, %s1515_s14, %s37_s20  }
   0xd   : > { %s1248_s27 = sshll.u32 %s154_s25, 9  ;;  %s167_s30 = scalar_lea.hbm %s2503_s0, %s1260_s26 }
   0xe   : > { %s158_s4 = scalar_lea.vmem [#allocation2], %s1248_s27  ;;  %p1611_p9 = pnand %p1333_p8, %p1589_p3 }
   0xf   : > { %s168_s5 = sshll.u32 %s158_s4, 4  ;;  %s155_s7 = scalar_lea.sflag [#allocation3], %s154_s25  ;;  %s169_s5 = int_to_ptr.vmem [resolvable:$true] %s168_s5 }
  0x10   : > { %p1451_p10 = pneg %p1611_p9  ;;  %s1462_s8 = scalar_lea.vmem %s169_s5, 8192 }
  0x11   : > { %p1463_p11 = scmp.ne.s32.totalorder %s169_s5, %s1462_s8  ;;  %s1529_s9 = smov [#allocation2]  }
  0x12   : > { %s1467_s10 = sshll.u32 %s1529_s9, 4  ;;  %s1468_s10 = int_to_ptr.vmem [resolvable:$false] %s1467_s10 }
  0x13   : > { %p1465_p12 = pnand %p1463_p11, %p1451_p10  ;;  %s1469_s11 = scalar_lea.vmem %s1468_s10, 16384 }
  0x14   : > { %p1470_p0 = scmp.lt.s32.totalorder %s169_s5, %s1468_s10  ;;  %p1471_p1 = scmp.lt.s32.totalorder %s1469_s11, %s1462_s8 }
  0x15   : > { %p1466_p13 = pneg %p1465_p12 }
  0x16   : > { %p1472_p2 = por %p1471_p1, %p1470_p0 }
  0x18   : > { %p1473_p3 = pnand %p1472_p2, %p1466_p13 }
  0x1a   : > { %1476 = shalt.err (!%p1473_p3)
}
  0x1b   : > { %s1530_s12 = smov 256   ;;  %s1531_s18 = smov 16  }
  0x1c   : > { %1332 = dma.hbm_to_vmem [thread:$0]  (!%p1611_p9), %s167_s30, 8192, %s169_s5, %s155_s7, %s1530_s12, %s1530_s12, %s1531_s18  }
  0x1d   : > { %p1251_p4 = scmp.ge.s32.totalorder %s1527_s17, 1  ;;  %p190_p5 = scmp.lt.s32.totalorder %s1527_s17, 3 }
  0x1f   : > { %p191_p6 = pnand %p1251_p4, %p190_p5 }
  0x21   : > { %194 = sbr.rel (%p191_p6) target bundleno = 610 (0x262), region = 32 }
  0x26   : > { %s196_s20 = sand.u32 1, %s1511_s13  }
  0x27   : > { %s1252_s21 = sshll.u32 %s196_s20, 9  ;;  %s197_s22 = scalar_lea.sflag [#allocation3], %s196_s20 }
  0x28   : > { %s1622_s25 = scalar_lea.vmem [#allocation2], %s1252_s21 }
  0x29   : > { %1502 = dma.done.wait (%p1596_p7), %s197_s22, 8192  }
  0x2a   : > { %1504 = vsyncadd (%p1596_p7), %s197_s22, 4294959104  ;;  %v1629_v0 = vld [vmem:[%s1622_s25] sm:$0xff]  ;;  %v1632_v1 = vld [vmem:[%s1622_s25 + $0x8] sm:$0xff]  ;;  %p236_p7 = scmp.lt.s32.totalorder %s1519_s15, 1  ;;  %vm1095_vm0 = vcmask 523264  }
  0x2b   : > { %v1635_v2 = vld [vmem:[%s1622_s25 + $0x10] sm:$0xff]  ;;  %v318_v3 = vadd.f32 %v1632_v1, %v1629_v0  ;;  %v1640_v4 = vld [vmem:[%s1622_s25 + $0x18] sm:$0xff]  ;;  %v1643_v5 = vld [vmem:[%s1622_s25 + $0x100] sm:$0xff] }
  0x2c   : > { %v1646_v6 = vld [vmem:[%s1622_s25 + $0x108] sm:$0xff]  ;;  %v321_v7 = vadd.f32 %v1640_v4, %v1635_v2  ;;  %v1651_v8 = vld [vmem:[%s1622_s25 + $0x110] sm:$0xff]  ;;  %v1654_v9 = vld [vmem:[%s1622_s25 + $0x118] sm:$0xff]  ;;  %s2617_s15 = smov (!%p236_p7, %s1519_s15), 1 }
  0x2d   : > { %319 = vadd.xlane.f32.xlu0 %v318_v3  ;;  %v366_v10 = vadd.f32 %v1646_v6, %v1643_v5  ;;  %v369_v11 = vadd.f32 %v1654_v9, %v1651_v8  ;;  %v1661_v12 = vld [vmem:[%s1622_s25 + $0x20] sm:$0xff]  ;;  %v1664_v13 = vld [vmem:[%s1622_s25 + $0x28] sm:$0xff]  ;;  %v1677_v18 = vld [vmem:[%s1622_s25 + $0x30] sm:$0xff]  ;;  %s1261_s23 = sshll.u32 %s2617_s15, 8  ;;  %s243_s4 = scalar_lea.vmem %s2505_s2, %s2617_s15 }
  0x2e   : > { %322 = vadd.xlane.f32.xlu1 %v321_v7  ;;  %v1667_v14 = vld [vmem:[%s1622_s25 + $0x120] sm:$0xff]  ;;  %v1670_v15 = vld [vmem:[%s1622_s25 + $0x128] sm:$0xff]  ;;  %v324_v16 = vadd.f32 %v1664_v13, %v1661_v12  ;;  %v1680_v19 = vld [vmem:[%s1622_s25 + $0x38] sm:$0xff]  ;;  %s1896_s28 = scalar_lea.vmem %s2504_s1, %s1261_s23  ;;  %s2387_s7 = scalar_lea.vmem %s2506_s3, %s1261_s23 }
  0x2f   : > { %v372_v17 = vadd.f32 %v1670_v15, %v1667_v14  ;;  %v1683_v20 = vld [vmem:[%s1622_s25 + $0x130] sm:$0xff]  ;;  %v1686_v21 = vld [vmem:[%s1622_s25 + $0x138] sm:$0xff]  ;;  %v327_v22 = vadd.f32 %v1680_v19, %v1677_v18  ;;  %v1693_v24 = vld [vmem:[%s1622_s25 + $0x40] sm:$0xff] }
  0x30   : > { %v375_v23 = vadd.f32 %v1686_v21, %v1683_v20  ;;  %v1696_v25 = vld [vmem:[%s1622_s25 + $0x48] sm:$0xff]  ;;  %v1699_v26 = vld [vmem:[%s1622_s25 + $0x140] sm:$0xff]  ;;  %v1709_v30 = vld [vmem:[%s1622_s25 + $0x50] sm:$0xff] }
  0x31   : > { %367 = vadd.xlane.f32.xlu0 %v366_v10  ;;  %v1702_v27 = vld [vmem:[%s1622_s25 + $0x148] sm:$0xff]  ;;  %v330_v28 = vadd.f32 %v1696_v25, %v1693_v24  ;;  %v1712_v31 = vld [vmem:[%s1622_s25 + $0x58] sm:$0xff]  ;;  %v1715_v32 = vld [vmem:[%s1622_s25 + $0x150] sm:$0xff] }
  0x32   : > { %370 = vadd.xlane.f32.xlu1 %v369_v11  ;;  %v378_v29 = vadd.f32 %v1702_v27, %v1699_v26  ;;  %v1718_v33 = vld [vmem:[%s1622_s25 + $0x158] sm:$0xff]  ;;  %v333_v34 = vadd.f32 %v1712_v31, %v1709_v30  ;;  %v1725_v36 = vld [vmem:[%s1622_s25 + $0x60] sm:$0xff]  ;;  %v1728_v37 = vld [vmem:[%s1622_s25 + $0x68] sm:$0xff] }
  0x33   : > { %v381_v35 = vadd.f32 %v1718_v33, %v1715_v32  ;;  %v1731_v38 = vld [vmem:[%s1622_s25 + $0x160] sm:$0xff]  ;;  %v1734_v39 = vld [vmem:[%s1622_s25 + $0x168] sm:$0xff]  ;;  %v336_v40 = vadd.f32 %v1728_v37, %v1725_v36  ;;  %v1741_v42 = vld [vmem:[%s1622_s25 + $0x70] sm:$0xff] }
  0x34   : > { %v384_v41 = vadd.f32 %v1734_v39, %v1731_v38  ;;  %v1744_v43 = vld [vmem:[%s1622_s25 + $0x78] sm:$0xff]  ;;  %v1747_v44 = vld [vmem:[%s1622_s25 + $0x170] sm:$0xff]  ;;  %v1757_v48 = vld [vmem:[%s1622_s25 + $0x80] sm:$0xff] }
  0x35   : > { %325 = vadd.xlane.f32.xlu0 %v324_v16  ;;  %v1750_v45 = vld [vmem:[%s1622_s25 + $0x178] sm:$0xff]  ;;  %v339_v46 = vadd.f32 %v1744_v43, %v1741_v42  ;;  %v1760_v49 = vld [vmem:[%s1622_s25 + $0x88] sm:$0xff]  ;;  %v1763_v50 = vld [vmem:[%s1622_s25 + $0x180] sm:$0xff] }
  0x36   : > { %373 = vadd.xlane.f32.xlu1 %v372_v17  ;;  %v387_v47 = vadd.f32 %v1750_v45, %v1747_v44  ;;  %v1766_v51 = vld [vmem:[%s1622_s25 + $0x188] sm:$0xff]  ;;  %v342_v52 = vadd.f32 %v1760_v49, %v1757_v48  ;;  %v1773_v54 = vld [vmem:[%s1622_s25 + $0x90] sm:$0xff]  ;;  %v1776_v55 = vld [vmem:[%s1622_s25 + $0x98] sm:$0xff] }
  0x37   : > { %v390_v53 = vadd.f32 %v1766_v51, %v1763_v50  ;;  %v1779_v56 = vld [vmem:[%s1622_s25 + $0x190] sm:$0xff]  ;;  %v1782_v57 = vld [vmem:[%s1622_s25 + $0x198] sm:$0xff]  ;;  %v345_v58 = vadd.f32 %v1776_v55, %v1773_v54  ;;  %v1789_v60 = vld [vmem:[%s1622_s25 + $0xa0] sm:$0xff] }
  0x38   : > { %v393_v59 = vadd.f32 %v1782_v57, %v1779_v56  ;;  %v1792_v61 = vld [vmem:[%s1622_s25 + $0xa8] sm:$0xff]  ;;  %v1795_v62 = vld [vmem:[%s1622_s25 + $0x1a0] sm:$0xff]  ;;  %v1805_v10 = vld [vmem:[%s1622_s25 + $0xb0] sm:$0xff] }
  0x39   : > { %328 = vadd.xlane.f32.xlu0 %v327_v22  ;;  %v1798_v63 = vld [vmem:[%s1622_s25 + $0x1a8] sm:$0xff]  ;;  %v348_v3 = vadd.f32 %v1792_v61, %v1789_v60  ;;  %v1808_v11 = vld [vmem:[%s1622_s25 + $0xb8] sm:$0xff]  ;;  %v1811_v16 = vld [vmem:[%s1622_s25 + $0x1b0] sm:$0xff] }
  0x3a   : > { %376 = vadd.xlane.f32.xlu1 %v375_v23  ;;  %v396_v7 = vadd.f32 %v1798_v63, %v1795_v62  ;;  %v1814_v17 = vld [vmem:[%s1622_s25 + $0x1b8] sm:$0xff]  ;;  %v351_v22 = vadd.f32 %v1808_v11, %v1805_v10 }
  0x3b   : > { %v399_v23 = vadd.f32 %v1814_v17, %v1811_v16 }
  0x3d   : > { %331 = vadd.xlane.f32.xlu0 %v330_v28  ;;  %v1821_v28 = vld [vmem:[%s1622_s25 + $0xc0] sm:$0xff] }
  0x3e   : > { %379 = vadd.xlane.f32.xlu1 %v378_v29  ;;  %v1824_v29 = vld [vmem:[%s1622_s25 + $0xc8] sm:$0xff] }
  0x41   : > { %334 = vadd.xlane.f32.xlu0 %v333_v34  ;;  %v1827_v34 = vld [vmem:[%s1622_s25 + $0x1c0] sm:$0xff] }
  0x42   : > { %382 = vadd.xlane.f32.xlu1 %v381_v35  ;;  %v1830_v35 = vld [vmem:[%s1622_s25 + $0x1c8] sm:$0xff] }
  0x45   : > { %337 = vadd.xlane.f32.xlu0 %v336_v40  ;;  %v354_v40 = vadd.f32 %v1824_v29, %v1821_v28 }
  0x46   : > { %385 = vadd.xlane.f32.xlu1 %v384_v41  ;;  %v402_v41 = vadd.f32 %v1830_v35, %v1827_v34 }
  0x49   : > { %340 = vadd.xlane.f32.xlu0 %v339_v46  ;;  %v1837_v46 = vld [vmem:[%s1622_s25 + $0xd0] sm:$0xff] }
  0x4a   : > { %388 = vadd.xlane.f32.xlu1 %v387_v47  ;;  %2544 = vst [vmem:[#allocation5_spill] sm:$0xff] %v1837_v46  ;;  %v1840_v47 = vld [vmem:[%s1622_s25 + $0xd8] sm:$0xff] }
  0x4b   : > { %2545 = vst [vmem:[#allocation6_spill] sm:$0xff] %v1840_v47 }
  0x4d   : > { %343 = vadd.xlane.f32.xlu0 %v342_v52  ;;  %v1843_v52 = vld [vmem:[%s1622_s25 + $0x1d0] sm:$0xff] }
  0x4e   : > { %391 = vadd.xlane.f32.xlu1 %v390_v53  ;;  %2546 = vst [vmem:[#allocation7_spill] sm:$0xff] %v1843_v52  ;;  %v1846_v53 = vld [vmem:[%s1622_s25 + $0x1d8] sm:$0xff] }
  0x4f   : > { %2547 = vst [vmem:[#allocation8_spill] sm:$0xff] %v1846_v53 }
  0x51   : > { %346 = vadd.xlane.f32.xlu0 %v345_v58  ;;  %v357_v58 = vadd.f32 %v1840_v47, %v1837_v46  ;;  %v1869_v47 = vld [vmem:[%s1622_s25 + $0xf0] sm:$0xff]  ;;  %v1878_v46 = vld [vmem:[%s1622_s25 + $0x1f8] sm:$0xff] }
  0x52   : > { %394 = vadd.xlane.f32.xlu1 %v393_v59  ;;  %v405_v59 = vadd.f32 %v1846_v53, %v1843_v52  ;;  %2552 = vst [vmem:[#allocation13_spill] sm:$0xff] %v1869_v47  ;;  %v1872_v53 = vld [vmem:[%s1622_s25 + $0xf8] sm:$0xff]  ;;  %v1875_v52 = vld [vmem:[%s1622_s25 + $0x1f0] sm:$0xff]  ;;  %2555 = vst [vmem:[#allocation16_spill] sm:$0xff] %v1878_v46 }
  0x53   : > { %2553 = vst [vmem:[#allocation14_spill] sm:$0xff] %v1872_v53  ;;  %2554 = vst [vmem:[#allocation15_spill] sm:$0xff] %v1875_v52 }
  0x55   : > { %349 = vadd.xlane.f32.xlu0 %v348_v3  ;;  %v1853_v3 = vld [vmem:[%s1622_s25 + $0xe0] sm:$0xff] }
  0x56   : > { %397 = vadd.xlane.f32.xlu1 %v396_v7  ;;  %2548 = vst [vmem:[#allocation9_spill] sm:$0xff] %v1853_v3  ;;  %v1856_v7 = vld [vmem:[%s1622_s25 + $0xe8] sm:$0xff] }
  0x57   : > { %2549 = vst [vmem:[#allocation10_spill] sm:$0xff] %v1856_v7 }
  0x59   : > { %352 = vadd.xlane.f32.xlu0 %v351_v22  ;;  %v1859_v22 = vld [vmem:[%s1622_s25 + $0x1e0] sm:$0xff] }
  0x5a   : > { %400 = vadd.xlane.f32.xlu1 %v399_v23  ;;  %2550 = vst [vmem:[#allocation11_spill] sm:$0xff] %v1859_v22  ;;  %v1862_v23 = vld [vmem:[%s1622_s25 + $0x1e8] sm:$0xff] }
  0x5b   : > { %2551 = vst [vmem:[#allocation12_spill] sm:$0xff] %v1862_v23 }
  0x5d   : > { %355 = vadd.xlane.f32.xlu0 %v354_v40  ;;  %v360_v40 = vadd.f32 %v1856_v7, %v1853_v3 }
  0x5e   : > { %403 = vadd.xlane.f32.xlu1 %v402_v41  ;;  %v408_v41 = vadd.f32 %v1862_v23, %v1859_v22  ;;  %v2519_v23 = vmov 0.0  }
  0x5f   : > { %870 = vmatprep.subr.mxu0 %v2519_v23  ;;  %1263 = vmatprep.subr.mxu1 %v2519_v23 }
  0x61   : > { %358 = vadd.xlane.f32.xlu0 %v357_v58  ;;  %v363_v58 = vadd.f32 %v1872_v53, %v1869_v47 }
  0x62   : > { %406 = vadd.xlane.f32.xlu1 %v405_v59  ;;  %v411_v59 = vadd.f32 %v1878_v46, %v1875_v52  ;;  %v860_v46 = vld [vmem:[%s1896_s28 + $0xe8] sm:$0xff] }
  0x65   : > { %361 = vadd.xlane.f32.xlu0 %v360_v40  ;;  %v846_v40 = vld [vmem:[%s1896_s28 + $0x78] sm:$0xff] }
  0x66   : > { %409 = vadd.xlane.f32.xlu1 %v408_v41  ;;  %v845_v41 = vld [vmem:[%s1896_s28 + $0x70] sm:$0xff]  ;;  %871 = vmatpush1.msra.mxu0 %v846_v40 }
  0x67   : > { %1295 = vmatpush1.msra.mxu1 %v846_v40  ;;  %872 = vmatprep.subr.mxu0 %v2519_v23  ;;  %v842_v40 = vld [vmem:[%s1896_s28 + $0x58] sm:$0xff] }
  0x68   : > { %1264 = vmatprep.subr.mxu1 %v2519_v23  ;;  %873 = vmatpush1.msra.mxu0 %v845_v41 }
  0x69   : > { %364 = vadd.xlane.f32.xlu0 %v363_v58  ;;  %v844_v58 = vld [vmem:[%s1896_s28 + $0x68] sm:$0xff]  ;;  %1296 = vmatpush1.msra.mxu1 %v845_v41  ;;  %v841_v41 = vld [vmem:[%s1896_s28 + $0x50] sm:$0xff] }
  0x6a   : > { %412 = vadd.xlane.f32.xlu1 %v411_v59  ;;  %874 = vmatprep.subr.mxu0 %v2519_v23  ;;  %v843_v59 = vld [vmem:[%s1896_s28 + $0x60] sm:$0xff] }
  0x6b   : > { %1265 = vmatprep.subr.mxu1 %v2519_v23  ;;  %875 = vmatpush1.msra.mxu0 %v844_v58 }
  0x6c   : > { %1297 = vmatpush1.msra.mxu1 %v844_v58  ;;  %876 = vmatprep.subr.mxu0 %v2519_v23  ;;  %v840_v58 = vld [vmem:[%s1896_s28 + $0x48] sm:$0xff] }
  0x6d   : > { %1266 = vmatprep.subr.mxu1 %v2519_v23  ;;  %877 = vmatpush1.msra.mxu0 %v843_v59 }
  0x6e   : > { %1298 = vmatpush1.msra.mxu1 %v843_v59  ;;  %878 = vmatprep.subr.mxu0 %v2519_v23  ;;  %v839_v59 = vld [vmem:[%s1896_s28 + $0x40] sm:$0xff] }
  0x6f   : > { %1267 = vmatprep.subr.mxu1 %v2519_v23  ;;  %879 = vmatpush1.msra.mxu0 %v842_v40 }
  0x70   : > { %1299 = vmatpush1.msra.mxu1 %v842_v40  ;;  %880 = vmatprep.subr.mxu0 %v2519_v23  ;;  %v838_v40 = vld [vmem:[%s1896_s28 + $0x38] sm:$0xff] }
  0x71   : > { %1268 = vmatprep.subr.mxu1 %v2519_v23  ;;  %881 = vmatpush1.msra.mxu0 %v841_v41 }
  0x72   : > { %1300 = vmatpush1.msra.mxu1 %v841_v41  ;;  %882 = vmatprep.subr.mxu0 %v2519_v23  ;;  %v837_v41 = vld [vmem:[%s1896_s28 + $0x30] sm:$0xff] }
  0x73   : > { %1269 = vmatprep.subr.mxu1 %v2519_v23  ;;  %883 = vmatpush1.msra.mxu0 %v840_v58 }
  0x74   : > { %1301 = vmatpush1.msra.mxu1 %v840_v58  ;;  %884 = vmatprep.subr.mxu0 %v2519_v23  ;;  %v836_v58 = vld [vmem:[%s1896_s28 + $0x28] sm:$0xff] }
  0x75   : > { %1270 = vmatprep.subr.mxu1 %v2519_v23  ;;  %885 = vmatpush1.msra.mxu0 %v839_v59 }
  0x76   : > { %1302 = vmatpush1.msra.mxu1 %v839_v59  ;;  %886 = vmatprep.subr.mxu0 %v2519_v23  ;;  %v835_v59 = vld [vmem:[%s1896_s28 + $0x20] sm:$0xff] }
  0x77   : > { %1271 = vmatprep.subr.mxu1 %v2519_v23  ;;  %887 = vmatpush1.msra.mxu0 %v838_v40 }
  0x78   : > { %1303 = vmatpush1.msra.mxu1 %v838_v40  ;;  %888 = vmatprep.subr.mxu0 %v2519_v23  ;;  %v834_v40 = vld [vmem:[%s1896_s28 + $0x18] sm:$0xff] }
  0x79   : > { %1272 = vmatprep.subr.mxu1 %v2519_v23  ;;  %889 = vmatpush1.msra.mxu0 %v837_v41 }
  0x7a   : > { %1304 = vmatpush1.msra.mxu1 %v837_v41  ;;  %890 = vmatprep.subr.mxu0 %v2519_v23  ;;  %v833_v41 = vld [vmem:[%s1896_s28 + $0x10] sm:$0xff] }
  0x7b   : > { %1273 = vmatprep.subr.mxu1 %v2519_v23  ;;  %891 = vmatpush1.msra.mxu0 %v836_v58 }
  0x7c   : > { %1305 = vmatpush1.msra.mxu1 %v836_v58  ;;  %892 = vmatprep.subr.mxu0 %v2519_v23  ;;  %v832_v58 = vld [vmem:[%s1896_s28 + $0x8] sm:$0xff] }
  0x7d   : > { %1274 = vmatprep.subr.mxu1 %v2519_v23  ;;  %893 = vmatpush1.msra.mxu0 %v835_v59 }
  0x7e   : > { %1306 = vmatpush1.msra.mxu1 %v835_v59  ;;  %894 = vmatprep.subr.mxu0 %v2519_v23  ;;  %v831_v59 = vld [vmem:[%s1896_s28] sm:$0xff] }
  0x7f   : > { %1275 = vmatprep.subr.mxu1 %v2519_v23  ;;  %895 = vmatpush1.msra.mxu0 %v834_v40 }
  0x80   : > { %1307 = vmatpush1.msra.mxu1 %v834_v40  ;;  %896 = vmatprep.subr.mxu0 %v2519_v23  ;;  %v862_v40 = vld [vmem:[%s1896_s28 + $0xf8] sm:$0xff] }
  0x81   : > { %1276 = vmatprep.subr.mxu1 %v2519_v23  ;;  %897 = vmatpush1.msra.mxu0 %v833_v41 }
  0x82   : > { %1308 = vmatpush1.msra.mxu1 %v833_v41  ;;  %898 = vmatprep.subr.mxu0 %v2519_v23  ;;  %v861_v41 = vld [vmem:[%s1896_s28 + $0xf0] sm:$0xff] }
  0x83   : > { %1277 = vmatprep.subr.mxu1 %v2519_v23  ;;  %899 = vmatpush1.msra.mxu0 %v832_v58 }
  0x84   : > { %1309 = vmatpush1.msra.mxu1 %v832_v58  ;;  %900 = vmatprep.subr.mxu0 %v2519_v23  ;;  %v859_v58 = vld [vmem:[%s1896_s28 + $0xe0] sm:$0xff] }
  0x85   : > { %1278 = vmatprep.subr.mxu1 %v2519_v23  ;;  %901 = vmatpush1.msra.mxu0 %v831_v59 }
  0x86   : > { %1310 = vmatpush1.msra.mxu1 %v831_v59  ;;  %902 = vmatprep.subr.mxu0 %v2519_v23  ;;  %v858_v59 = vld [vmem:[%s1896_s28 + $0xd8] sm:$0xff] }
  0x87   : > { %1279 = vmatprep.subr.mxu1 %v2519_v23  ;;  %903 = vmatpush2.msra.mxu0 %v862_v40 }
  0x88   : > { %1311 = vmatpush2.msra.mxu1 %v862_v40  ;;  %904 = vmatprep.subr.mxu0 %v2519_v23 }
  0x89   : > { %1280 = vmatprep.subr.mxu1 %v2519_v23  ;;  %905 = vmatpush2.msra.mxu0 %v861_v41 }
  0x8a   : > { %1312 = vmatpush2.msra.mxu1 %v861_v41  ;;  %906 = vmatprep.subr.mxu0 %v2519_v23 }
  0x8b   : > { %1281 = vmatprep.subr.mxu1 %v2519_v23  ;;  %907 = vmatpush2.msra.mxu0 %v860_v46 }
  0x8c   : > { %1313 = vmatpush2.msra.mxu1 %v860_v46  ;;  %908 = vmatprep.subr.mxu0 %v2519_v23 }
  0x8d   : > { %1282 = vmatprep.subr.mxu1 %v2519_v23  ;;  %909 = vmatpush2.msra.mxu0 %v859_v58 }
  0x8e   : > { %1314 = vmatpush2.msra.mxu1 %v859_v58  ;;  %910 = vmatprep.subr.mxu0 %v2519_v23 }
  0x8f   : > { %1283 = vmatprep.subr.mxu1 %v2519_v23  ;;  %911 = vmatpush2.msra.mxu0 %v858_v59 }
  0x90   : > { %1315 = vmatpush2.msra.mxu1 %v858_v59  ;;  %912 = vmatprep.subr.mxu0 %v2519_v23 }
  0x91   : > { %1284 = vmatprep.subr.mxu1 %v2519_v23 }
  0xb6   : > { %v320_v40 = vpop.xlane.xlu0 %319 }
  0xb7   : > { %v415_v41 = vmul.f32 0.00390625, %v320_v40  ;;  %v323_v46 = vpop.xlane.xlu1 %322 }
  0xb8   : > { %v416_v52 = vmul.f32 0.00390625, %v323_v46 }
  0xb9   : > { %v1962_v53 = vsub.f32 %v1629_v0, %v415_v41  ;;  %v1965_v47 = vsub.f32 %v1632_v1, %v415_v41 }
  0xba   : > { %v1968_v58 = vsub.f32 %v1635_v2, %v416_v52  ;;  %v1971_v22 = vsub.f32 %v1640_v4, %v416_v52  ;;  %v368_v59 = vpop.xlane.xlu0 %367 }
  0xbb   : > { %2556 = vst [vmem:[#allocation17_spill] sm:$0xff] %v1962_v53  ;;  %2557 = vst [vmem:[#allocation18_spill] sm:$0xff] %v1965_v47  ;;  %v431_v7 = vmul.f32 0.00390625, %v368_v59  ;;  %v371_v3 = vpop.xlane.xlu1 %370  ;;  %v511_v40 = vmul.f32 %v1962_v53, %v1962_v53  ;;  %v512_v46 = vmul.f32 %v1965_v47, %v1965_v47 }
  0xbc   : > { %2558 = vst [vmem:[#allocation19_spill] sm:$0xff] %v1968_v58  ;;  %2559 = vst [vmem:[#allocation20_spill] sm:$0xff] %v1971_v22  ;;  %v432_v0 = vmul.f32 0.00390625, %v371_v3  ;;  %v513_v1 = vmul.f32 %v1968_v58, %v1968_v58  ;;  %v514_v2 = vmul.f32 %v1971_v22, %v1971_v22 }
  0xbd   : > { %v1982_v41 = vsub.f32 %v1643_v5, %v431_v7  ;;  %v1985_v4 = vsub.f32 %v1646_v6, %v431_v7  ;;  %v575_v52 = vadd.f32 %v512_v46, %v511_v40 }
  0xbe   : > { %v1988_v59 = vsub.f32 %v1651_v8, %v432_v0  ;;  %v1991_v23 = vsub.f32 %v1654_v9, %v432_v0  ;;  %v326_v3 = vpop.xlane.xlu0 %325  ;;  %v578_v47 = vadd.f32 %v514_v2, %v513_v1 }
  0xbf   : > { %v417_v53 = vmul.f32 0.00390625, %v326_v3  ;;  %576 = vadd.xlane.f32.xlu0 %v575_v52  ;;  %v374_v58 = vpop.xlane.xlu1 %373  ;;  %v543_v22 = vmul.f32 %v1982_v41, %v1982_v41  ;;  %v544_v5 = vmul.f32 %v1985_v4, %v1985_v4 }
  0xc0   : > { %v433_v6 = vmul.f32 0.00390625, %v374_v58  ;;  %v545_v7 = vmul.f32 %v1988_v59, %v1988_v59  ;;  %v546_v8 = vmul.f32 %v1991_v23, %v1991_v23 }
  0xc1   : > { %v2002_v9 = vsub.f32 %v1661_v12, %v417_v53  ;;  %v2005_v40 = vsub.f32 %v1664_v13, %v417_v53  ;;  %v623_v46 = vadd.f32 %v544_v5, %v543_v22 }
  0xc2   : > { %v2008_v0 = vsub.f32 %v1667_v14, %v433_v6  ;;  %v2011_v1 = vsub.f32 %v1670_v15, %v433_v6  ;;  %v329_v58 = vpop.xlane.xlu0 %328  ;;  %v626_v3 = vadd.f32 %v546_v8, %v545_v7 }
  0xc3   : > { %v418_v2 = vmul.f32 0.00390625, %v329_v58  ;;  %579 = vadd.xlane.f32.xlu0 %v578_v47  ;;  %624 = vadd.xlane.f32.xlu1 %v623_v46  ;;  %v377_v52 = vpop.xlane.xlu1 %376  ;;  %v515_v12 = vmul.f32 %v2002_v9, %v2002_v9  ;;  %v516_v13 = vmul.f32 %v2005_v40, %v2005_v40 }
  0xc4   : > { %v434_v53 = vmul.f32 0.00390625, %v377_v52  ;;  %v547_v14 = vmul.f32 %v2008_v0, %v2008_v0  ;;  %v548_v15 = vmul.f32 %v2011_v1, %v2011_v1 }
  0xc5   : > { %v2022_v22 = vsub.f32 %v1677_v18, %v418_v2  ;;  %v2025_v47 = vsub.f32 %v1680_v19, %v418_v2  ;;  %v581_v5 = vadd.f32 %v516_v13, %v515_v12  ;;  %v857_v12 = vld [vmem:[%s1896_s28 + $0xd0] sm:$0xff] }
  0xc6   : > { %v2028_v6 = vsub.f32 %v1683_v20, %v434_v53  ;;  %v2031_v7 = vsub.f32 %v1686_v21, %v434_v53  ;;  %v332_v8 = vpop.xlane.xlu0 %331  ;;  %v629_v52 = vadd.f32 %v548_v15, %v547_v14  ;;  %913 = vmatpush2.msra.mxu0 %v857_v12  ;;  %1316 = vmatpush2.msra.mxu1 %v857_v12  ;;  %v855_v12 = vld [vmem:[%s1896_s28 + $0xc0] sm:$0xff] }
  0xc7   : > { %v419_v46 = vmul.f32 0.00390625, %v332_v8  ;;  %627 = vadd.xlane.f32.xlu1 %v626_v3  ;;  %582 = vadd.xlane.f32.xlu0 %v581_v5  ;;  %v380_v58 = vpop.xlane.xlu1 %379  ;;  %v517_v18 = vmul.f32 %v2022_v22, %v2022_v22  ;;  %v518_v19 = vmul.f32 %v2025_v47, %v2025_v47  ;;  %v2560_v8 = vmov 0.0  }
  0xc8   : > { %v435_v2 = vmul.f32 0.00390625, %v380_v58  ;;  %v549_v20 = vmul.f32 %v2028_v6, %v2028_v6  ;;  %v550_v21 = vmul.f32 %v2031_v7, %v2031_v7  ;;  %914 = vmatprep.subr.mxu0 %v2560_v8  ;;  %v856_v58 = vld [vmem:[%s1896_s28 + $0xc8] sm:$0xff]  ;;  %1285 = vmatprep.subr.mxu1 %v2560_v8 }
  0xc9   : > { %v2043_v3 = vsub.f32 %v1693_v24, %v419_v46  ;;  %v2046_v13 = vsub.f32 %v1696_v25, %v419_v46  ;;  %v584_v53 = vadd.f32 %v518_v19, %v517_v18  ;;  %915 = vmatpush2.msra.mxu0 %v856_v58  ;;  %1317 = vmatpush2.msra.mxu1 %v856_v58 }
  0xca   : > { %v2049_v14 = vsub.f32 %v1699_v26, %v435_v2  ;;  %v2052_v15 = vsub.f32 %v1702_v27, %v435_v2  ;;  %v335_v5 = vpop.xlane.xlu0 %334  ;;  %v632_v46 = vadd.f32 %v550_v21, %v549_v20  ;;  %916 = vmatprep.subr.mxu0 %v2560_v8  ;;  %1286 = vmatprep.subr.mxu1 %v2560_v8 }
  0xcb   : > { %v420_v24 = vmul.f32 0.00390625, %v335_v5  ;;  %630 = vadd.xlane.f32.xlu1 %v629_v52  ;;  %585 = vadd.xlane.f32.xlu0 %v584_v53  ;;  %v383_v25 = vpop.xlane.xlu1 %382  ;;  %v519_v18 = vmul.f32 %v2043_v3, %v2043_v3  ;;  %v520_v26 = vmul.f32 %v2046_v13, %v2046_v13 }
  0xcc   : > { %v436_v27 = vmul.f32 0.00390625, %v383_v25  ;;  %v551_v19 = vmul.f32 %v2049_v14, %v2049_v14  ;;  %v552_v2 = vmul.f32 %v2052_v15, %v2052_v15  ;;  %917 = vmatpush2.msra.mxu0 %v855_v12  ;;  %1318 = vmatpush2.msra.mxu1 %v855_v12 }
  0xcd   : > { %v2066_v52 = vsub.f32 %v1709_v30, %v420_v24  ;;  %v2069_v20 = vsub.f32 %v1712_v31, %v420_v24  ;;  %v587_v21 = vadd.f32 %v520_v26, %v519_v18  ;;  %918 = vmatprep.subr.mxu0 %v2560_v8  ;;  %1287 = vmatprep.subr.mxu1 %v2560_v8 }
  0xce   : > { %v2075_v53 = vsub.f32 %v1715_v32, %v436_v27  ;;  %v2078_v5 = vsub.f32 %v1718_v33, %v436_v27  ;;  %v338_v58 = vpop.xlane.xlu0 %337  ;;  %v635_v24 = vadd.f32 %v552_v2, %v551_v19  ;;  %v854_v32 = vld [vmem:[%s1896_s28 + $0xb8] sm:$0xff] }
  0xcf   : > { %v421_v30 = vmul.f32 0.00390625, %v338_v58  ;;  %633 = vadd.xlane.f32.xlu1 %v632_v46  ;;  %588 = vadd.xlane.f32.xlu0 %v587_v21  ;;  %v386_v31 = vpop.xlane.xlu1 %385  ;;  %v521_v25 = vmul.f32 %v2066_v52, %v2066_v52  ;;  %v522_v18 = vmul.f32 %v2069_v20, %v2069_v20  ;;  %v853_v21 = vld [vmem:[%s1896_s28 + $0xb0] sm:$0xff] }
  0xd0   : > { %v437_v26 = vmul.f32 0.00390625, %v386_v31  ;;  %v553_v33 = vmul.f32 %v2075_v53, %v2075_v53  ;;  %v554_v27 = vmul.f32 %v2078_v5, %v2078_v5  ;;  %919 = vmatpush2.msra.mxu0 %v854_v32  ;;  %1319 = vmatpush2.msra.mxu1 %v854_v32 }
  0xd1   : > { %v2092_v46 = vsub.f32 %v1725_v36, %v421_v30  ;;  %v2095_v19 = vsub.f32 %v1728_v37, %v421_v30  ;;  %v590_v2 = vadd.f32 %v522_v18, %v521_v25  ;;  %920 = vmatprep.subr.mxu0 %v2560_v8  ;;  %1288 = vmatprep.subr.mxu1 %v2560_v8  ;;  %v852_v18 = vld [vmem:[%s1896_s28 + $0xa8] sm:$0xff] }
  0xd2   : > { %v2099_v12 = vsub.f32 %v1731_v38, %v437_v26  ;;  %v2102_v58 = vsub.f32 %v1734_v39, %v437_v26  ;;  %v341_v31 = vpop.xlane.xlu0 %340  ;;  %v638_v30 = vadd.f32 %v554_v27, %v553_v33  ;;  %921 = vmatpush2.msra.mxu0 %v853_v21  ;;  %1320 = vmatpush2.msra.mxu1 %v853_v21  ;;  %v851_v21 = vld [vmem:[%s1896_s28 + $0xa0] sm:$0xff] }
  0xd3   : > { %v422_v36 = vmul.f32 0.00390625, %v341_v31  ;;  %636 = vadd.xlane.f32.xlu1 %v635_v24  ;;  %591 = vadd.xlane.f32.xlu0 %v590_v2  ;;  %v389_v37 = vpop.xlane.xlu1 %388  ;;  %v523_v25 = vmul.f32 %v2092_v46, %v2092_v46  ;;  %v524_v38 = vmul.f32 %v2095_v19, %v2095_v19 }
  0xd4   : > { %v438_v39 = vmul.f32 0.00390625, %v389_v37  ;;  %v555_v32 = vmul.f32 %v2099_v12, %v2099_v12  ;;  %v556_v26 = vmul.f32 %v2102_v58, %v2102_v58  ;;  %922 = vmatprep.subr.mxu0 %v2560_v8  ;;  %1289 = vmatprep.subr.mxu1 %v2560_v8 }
  0xd5   : > { %v2116_v24 = vsub.f32 %v1741_v42, %v422_v36  ;;  %v2119_v33 = vsub.f32 %v1744_v43, %v422_v36  ;;  %v593_v27 = vadd.f32 %v524_v38, %v523_v25  ;;  %923 = vmatpush2.msra.mxu0 %v852_v18  ;;  %1321 = vmatpush2.msra.mxu1 %v852_v18 }
  0xd6   : > { %v2124_v2 = vsub.f32 %v1747_v44, %v438_v39  ;;  %v2127_v31 = vsub.f32 %v1750_v45, %v438_v39  ;;  %v344_v37 = vpop.xlane.xlu0 %343  ;;  %v641_v36 = vadd.f32 %v556_v26, %v555_v32  ;;  %924 = vmatprep.subr.mxu0 %v2560_v8  ;;  %1290 = vmatprep.subr.mxu1 %v2560_v8  ;;  %v850_v26 = vld [vmem:[%s1896_s28 + $0x98] sm:$0xff] }
  0xd7   : > { %v423_v42 = vmul.f32 0.00390625, %v344_v37  ;;  %639 = vadd.xlane.f32.xlu1 %v638_v30  ;;  %594 = vadd.xlane.f32.xlu0 %v593_v27  ;;  %v392_v43 = vpop.xlane.xlu1 %391  ;;  %v525_v25 = vmul.f32 %v2116_v24, %v2116_v24  ;;  %v526_v44 = vmul.f32 %v2119_v33, %v2119_v33 }
  0xd8   : > { %v439_v38 = vmul.f32 0.00390625, %v392_v43  ;;  %v557_v45 = vmul.f32 %v2124_v2, %v2124_v2  ;;  %v558_v39 = vmul.f32 %v2127_v31, %v2127_v31  ;;  %925 = vmatpush2.msra.mxu0 %v851_v21  ;;  %1322 = vmatpush2.msra.mxu1 %v851_v21  ;;  %v849_v21 = vld [vmem:[%s1896_s28 + $0x90] sm:$0xff] }
  0xd9   : > { %v2141_v30 = vsub.f32 %v1757_v48, %v423_v42  ;;  %v2144_v18 = vsub.f32 %v1760_v49, %v423_v42  ;;  %v596_v32 = vadd.f32 %v526_v44, %v525_v25  ;;  %926 = vmatprep.subr.mxu0 %v2560_v8  ;;  %1291 = vmatprep.subr.mxu1 %v2560_v8 }
  0xda   : > { %v2148_v27 = vsub.f32 %v1763_v50, %v439_v38  ;;  %v2151_v37 = vsub.f32 %v1766_v51, %v439_v38  ;;  %v347_v43 = vpop.xlane.xlu0 %346  ;;  %v644_v42 = vadd.f32 %v558_v39, %v557_v45  ;;  %927 = vmatpush2.msra.mxu0 %v850_v26  ;;  %1323 = vmatpush2.msra.mxu1 %v850_v26  ;;  %v848_v26 = vld [vmem:[%s1896_s28 + $0x88] sm:$0xff] }
  0xdb   : > { %v424_v48 = vmul.f32 0.00390625, %v347_v43  ;;  %642 = vadd.xlane.f32.xlu1 %v641_v36  ;;  %597 = vadd.xlane.f32.xlu0 %v596_v32  ;;  %v395_v49 = vpop.xlane.xlu1 %394  ;;  %v527_v25 = vmul.f32 %v2141_v30, %v2141_v30  ;;  %v528_v50 = vmul.f32 %v2144_v18, %v2144_v18 }
  0xdc   : > { %v440_v51 = vmul.f32 0.00390625, %v395_v49  ;;  %v559_v44 = vmul.f32 %v2148_v27, %v2148_v27  ;;  %v560_v38 = vmul.f32 %v2151_v37, %v2151_v37  ;;  %928 = vmatprep.subr.mxu0 %v2560_v8  ;;  %1292 = vmatprep.subr.mxu1 %v2560_v8 }
  0xdd   : > { %v2165_v36 = vsub.f32 %v1773_v54, %v424_v48  ;;  %v2168_v45 = vsub.f32 %v1776_v55, %v424_v48  ;;  %v599_v39 = vadd.f32 %v528_v50, %v527_v25  ;;  %929 = vmatpush2.msra.mxu0 %v849_v21  ;;  %1324 = vmatpush2.msra.mxu1 %v849_v21 }
  0xde   : > { %v2173_v32 = vsub.f32 %v1779_v56, %v440_v51  ;;  %v2176_v43 = vsub.f32 %v1782_v57, %v440_v51  ;;  %v350_v49 = vpop.xlane.xlu0 %349  ;;  %v647_v48 = vadd.f32 %v560_v38, %v559_v44  ;;  %930 = vmatprep.subr.mxu0 %v2560_v8  ;;  %1293 = vmatprep.subr.mxu1 %v2560_v8  ;;  %v847_v38 = vld [vmem:[%s1896_s28 + $0x80] sm:$0xff] }
  0xdf   : > { %v425_v54 = vmul.f32 0.00390625, %v350_v49  ;;  %645 = vadd.xlane.f32.xlu1 %v644_v42  ;;  %600 = vadd.xlane.f32.xlu0 %v599_v39  ;;  %v398_v55 = vpop.xlane.xlu1 %397  ;;  %v529_v25 = vmul.f32 %v2165_v36, %v2165_v36  ;;  %v530_v56 = vmul.f32 %v2168_v45, %v2168_v45 }
  0xe0   : > { %v441_v50 = vmul.f32 0.00390625, %v398_v55  ;;  %v561_v57 = vmul.f32 %v2173_v32, %v2173_v32  ;;  %v562_v51 = vmul.f32 %v2176_v43, %v2176_v43  ;;  %931 = vmatpush2.msra.mxu0 %v848_v26  ;;  %1325 = vmatpush2.msra.mxu1 %v848_v26 }
  0xe1   : > { %v2190_v42 = vsub.f32 %v1789_v60, %v425_v54  ;;  %v2193_v21 = vsub.f32 %v1792_v61, %v425_v54  ;;  %v602_v44 = vadd.f32 %v530_v56, %v529_v25  ;;  %932 = vmatprep.subr.mxu0 %v2560_v8  ;;  %1294 = vmatprep.subr.mxu1 %v2560_v8 }
  0xe2   : > { %v2197_v39 = vsub.f32 %v1795_v62, %v441_v50  ;;  %v2200_v49 = vsub.f32 %v1798_v63, %v441_v50  ;;  %v353_v55 = vpop.xlane.xlu0 %352  ;;  %v650_v54 = vadd.f32 %v562_v51, %v561_v57  ;;  %933 = vmatpush2.msra.mxu0 %v847_v38  ;;  %1326 = vmatpush2.msra.mxu1 %v847_v38 }
  0xe3   : > { %v426_v60 = vmul.f32 0.00390625, %v353_v55  ;;  %648 = vadd.xlane.f32.xlu1 %v647_v48  ;;  %603 = vadd.xlane.f32.xlu0 %v602_v44  ;;  %v401_v61 = vpop.xlane.xlu1 %400  ;;  %v531_v25 = vmul.f32 %v2190_v42, %v2190_v42  ;;  %v532_v62 = vmul.f32 %v2193_v21, %v2193_v21 }
  0xe4   : > { %2561 = vst [vmem:[#allocation21_spill] sm:$0xff] %v2197_v39  ;;  %v442_v26 = vmul.f32 0.00390625, %v401_v61  ;;  %v563_v63 = vmul.f32 %v2197_v39, %v2197_v39  ;;  %v564_v56 = vmul.f32 %v2200_v49, %v2200_v49 }
  0xe5   : > { %v2213_v8 = vsub.f32 %v1805_v10, %v426_v60  ;;  %v2216_v48 = vsub.f32 %v1808_v11, %v426_v60  ;;  %v605_v50 = vadd.f32 %v532_v62, %v531_v25 }
  0xe6   : > { %v2219_v57 = vsub.f32 %v1811_v16, %v442_v26  ;;  %v2222_v51 = vsub.f32 %v1814_v17, %v442_v26  ;;  %v356_v44 = vpop.xlane.xlu0 %355  ;;  %v653_v39 = vadd.f32 %v564_v56, %v563_v63 }
  0xe7   : > { %v427_v55 = vmul.f32 0.00390625, %v356_v44  ;;  %651 = vadd.xlane.f32.xlu1 %v650_v54  ;;  %606 = vadd.xlane.f32.xlu0 %v605_v50  ;;  %v404_v61 = vpop.xlane.xlu1 %403  ;;  %v533_v10 = vmul.f32 %v2213_v8, %v2213_v8  ;;  %v534_v11 = vmul.f32 %v2216_v48, %v2216_v48 }
  0xe8   : > { %v443_v38 = vmul.f32 0.00390625, %v404_v61  ;;  %v565_v16 = vmul.f32 %v2219_v57, %v2219_v57  ;;  %v566_v17 = vmul.f32 %v2222_v51, %v2222_v51  ;;  %v2566_v61 = vld [vmem:[#allocation5_spill] sm:$0xff] }
  0xe9   : > { %v2233_v60 = vsub.f32 %v1821_v28, %v427_v55  ;;  %v2236_v54 = vsub.f32 %v1824_v29, %v427_v55  ;;  %v608_v25 = vadd.f32 %v534_v11, %v533_v10 }
  0xea   : > { %v2239_v62 = vsub.f32 %v1827_v34, %v443_v38  ;;  %v2242_v26 = vsub.f32 %v1830_v35, %v443_v38  ;;  %v359_v63 = vpop.xlane.xlu0 %358  ;;  %v656_v44 = vadd.f32 %v566_v17, %v565_v16  ;;  %v2570_v16 = vld [vmem:[#allocation7_spill] sm:$0xff] }
  0xeb   : > { %2562 = vst [vmem:[#allocation22_spill] sm:$0xff] %v2233_v60  ;;  %2563 = vst [vmem:[#allocation23_spill] sm:$0xff] %v2236_v54  ;;  %v428_v56 = vmul.f32 0.00390625, %v359_v63  ;;  %654 = vadd.xlane.f32.xlu1 %v653_v39  ;;  %609 = vadd.xlane.f32.xlu0 %v608_v25  ;;  %v407_v50 = vpop.xlane.xlu1 %406  ;;  %v535_v28 = vmul.f32 %v2233_v60, %v2233_v60  ;;  %v536_v29 = vmul.f32 %v2236_v54, %v2236_v54  ;;  %v2568_v39 = vld [vmem:[#allocation6_spill] sm:$0xff]  ;;  %v2572_v25 = vld [vmem:[#allocation8_spill] sm:$0xff] }
  0xec   : > { %2564 = vst [vmem:[#allocation24_spill] sm:$0xff] %v2239_v62  ;;  %2565 = vst [vmem:[#allocation25_spill] sm:$0xff] %v2242_v26  ;;  %v444_v55 = vmul.f32 0.00390625, %v407_v50  ;;  %v567_v34 = vmul.f32 %v2239_v62, %v2239_v62  ;;  %v568_v35 = vmul.f32 %v2242_v26, %v2242_v26 }
  0xed   : > { %v2253_v10 = vsub.f32 %v2566_v61, %v428_v56  ;;  %v2256_v11 = vsub.f32 %v2568_v39, %v428_v56  ;;  %v611_v38 = vadd.f32 %v536_v29, %v535_v28 }
  0xee   : > { %v2259_v17 = vsub.f32 %v2570_v16, %v444_v55  ;;  %v2262_v63 = vsub.f32 %v2572_v25, %v444_v55  ;;  %v362_v50 = vpop.xlane.xlu0 %361  ;;  %v659_v54 = vadd.f32 %v568_v35, %v567_v34  ;;  %v2573_v55 = vld [vmem:[#allocation9_spill] sm:$0xff]  ;;  %v2577_v35 = vld [vmem:[#allocation11_spill] sm:$0xff] }
  0xef   : > { %2567 = vst [vmem:[#allocation5_spill] sm:$0xff] %v2253_v10  ;;  %2569 = vst [vmem:[#allocation6_spill] sm:$0xff] %v2256_v11  ;;  %v429_v60 = vmul.f32 0.00390625, %v362_v50  ;;  %657 = vadd.xlane.f32.xlu1 %v656_v44  ;;  %612 = vadd.xlane.f32.xlu0 %v611_v38  ;;  %v410_v62 = vpop.xlane.xlu1 %409  ;;  %v537_v61 = vmul.f32 %v2253_v10, %v2253_v10  ;;  %v538_v56 = vmul.f32 %v2256_v11, %v2256_v11  ;;  %v2575_v44 = vld [vmem:[#allocation10_spill] sm:$0xff]  ;;  %v2579_v50 = vld [vmem:[#allocation12_spill] sm:$0xff] }
  0xf0   : > { %2571 = vst [vmem:[#allocation7_spill] sm:$0xff] %v2259_v17  ;;  %v445_v39 = vmul.f32 0.00390625, %v410_v62  ;;  %v569_v28 = vmul.f32 %v2259_v17, %v2259_v17  ;;  %v570_v29 = vmul.f32 %v2262_v63, %v2262_v63 }
  0xf1   : > { %v2273_v16 = vsub.f32 %v2573_v55, %v429_v60  ;;  %v2276_v38 = vsub.f32 %v2575_v44, %v429_v60  ;;  %v614_v34 = vadd.f32 %v538_v56, %v537_v61 }
  0xf2   : > { %v2279_v25 = vsub.f32 %v2577_v35, %v445_v39  ;;  %v2282_v10 = vsub.f32 %v2579_v50, %v445_v39  ;;  %v365_v62 = vpop.xlane.xlu0 %364  ;;  %v662_v26 = vadd.f32 %v570_v29, %v569_v28  ;;  %v2581_v39 = vld [vmem:[#allocation13_spill] sm:$0xff]  ;;  %v2585_v29 = vld [vmem:[#allocation15_spill] sm:$0xff] }
  0xf3   : > { %2574 = vst [vmem:[#allocation8_spill] sm:$0xff] %v2273_v16  ;;  %2576 = vst [vmem:[#allocation9_spill] sm:$0xff] %v2276_v38  ;;  %v430_v11 = vmul.f32 0.00390625, %v365_v62  ;;  %660 = vadd.xlane.f32.xlu1 %v659_v54  ;;  %615 = vadd.xlane.f32.xlu0 %v614_v34  ;;  %v413_v17 = vpop.xlane.xlu1 %412  ;;  %v539_v55 = vmul.f32 %v2273_v16, %v2273_v16  ;;  %v540_v60 = vmul.f32 %v2276_v38, %v2276_v38  ;;  %v2583_v54 = vld [vmem:[#allocation14_spill] sm:$0xff]  ;;  %v2587_v62 = vld [vmem:[#allocation16_spill] sm:$0xff] }
  0xf4   : > { %2578 = vst [vmem:[#allocation10_spill] sm:$0xff] %v2279_v25  ;;  %2580 = vst [vmem:[#allocation11_spill] sm:$0xff] %v2282_v10  ;;  %v446_v44 = vmul.f32 0.00390625, %v413_v17  ;;  %v571_v61 = vmul.f32 %v2279_v25, %v2279_v25  ;;  %v572_v56 = vmul.f32 %v2282_v10, %v2282_v10 }
  0xf5   : > { %v2293_v35 = vsub.f32 %v2581_v39, %v430_v11  ;;  %v2296_v34 = vsub.f32 %v2583_v54, %v430_v11  ;;  %v617_v28 = vadd.f32 %v540_v60, %v539_v55 }
  0xf6   : > { %v2299_v50 = vsub.f32 %v2585_v29, %v446_v44  ;;  %v2302_v16 = vsub.f32 %v2587_v62, %v446_v44  ;;  %v665_v17 = vadd.f32 %v572_v56, %v571_v61 }
  0xf7   : > { %2582 = vst [vmem:[#allocation12_spill] sm:$0xff] %v2293_v35  ;;  %2584 = vst [vmem:[#allocation13_spill] sm:$0xff] %v2296_v34  ;;  %663 = vadd.xlane.f32.xlu1 %v662_v26  ;;  %618 = vadd.xlane.f32.xlu0 %v617_v28  ;;  %v541_v25 = vmul.f32 %v2293_v35, %v2293_v35  ;;  %v542_v39 = vmul.f32 %v2296_v34, %v2296_v34 }
  0xf8   : > { %2586 = vst [vmem:[#allocation14_spill] sm:$0xff] %v2299_v50  ;;  %2588 = vst [vmem:[#allocation15_spill] sm:$0xff] %v2302_v16  ;;  %v573_v11 = vmul.f32 %v2299_v50, %v2299_v50  ;;  %v574_v55 = vmul.f32 %v2302_v16, %v2302_v16 }
  0xf9   : > { %v620_v60 = vadd.f32 %v542_v39, %v541_v25 }
  0xfa   : > { %v668_v44 = vadd.f32 %v574_v55, %v573_v11 }
  0xfb   : > { %666 = vadd.xlane.f32.xlu1 %v665_v17  ;;  %621 = vadd.xlane.f32.xlu0 %v620_v60 }
  0xff   : > { %669 = vadd.xlane.f32.xlu1 %v668_v44 }
 0x148   : > { %v577_v26 = vpop.xlane.xlu0 %576 }
 0x149   : > { %v671_v54 = vmul.f32 0.00390625, %v577_v26 }
 0x14b   : > { %v703_v61 = vadd.f32 1e-06, %v671_v54 }
 0x14c   : > { %v625_v56 = vpop.xlane.xlu1 %624  ;;  %v580_v28 = vpop.xlane.xlu0 %579 }
 0x14d   : > { %1385 = vrsqrt.f32 %v703_v61  ;;  %v687_v29 = vmul.f32 0.00390625, %v625_v56  ;;  %v672_v62 = vmul.f32 0.00390625, %v580_v28 }
 0x14f   : > { %v719_v35 = vadd.f32 1e-06, %v687_v29  ;;  %v704_v34 = vadd.f32 1e-06, %v672_v62 }
 0x150   : > { %v628_v10 = vpop.xlane.xlu1 %627  ;;  %v583_v50 = vpop.xlane.xlu0 %582 }
 0x151   : > { %1387 = vrsqrt.f32 %v719_v35  ;;  %v688_v38 = vmul.f32 0.00390625, %v628_v10  ;;  %v673_v16 = vmul.f32 0.00390625, %v583_v50 }
 0x152   : > { %1389 = vrsqrt.f32 %v704_v34  ;;  %v2589_v34 = vld [vmem:[#allocation18_spill] sm:$0xff] }
 0x153   : > { %v720_v25 = vadd.f32 1e-06, %v688_v38  ;;  %v705_v17 = vadd.f32 1e-06, %v673_v16  ;;  %v2590_v16 = vld [vmem:[#allocation17_spill] sm:$0xff] }
 0x154   : > { %v631_v39 = vpop.xlane.xlu1 %630  ;;  %v586_v11 = vpop.xlane.xlu0 %585 }
 0x155   : > { %1391 = vrsqrt.f32 %v720_v25  ;;  %v689_v55 = vmul.f32 0.00390625, %v631_v39  ;;  %v674_v60 = vmul.f32 0.00390625, %v586_v11 }
 0x156   : > { %1393 = vrsqrt.f32 %v705_v17 }
 0x157   : > { %v721_v44 = vadd.f32 1e-06, %v689_v55  ;;  %v706_v26 = vadd.f32 1e-06, %v674_v60 }
 0x158   : > { %v634_v54 = vpop.xlane.xlu1 %633  ;;  %v589_v61 = vpop.xlane.xlu0 %588 }
 0x159   : > { %1395 = vrsqrt.f32 %v721_v44  ;;  %v690_v56 = vmul.f32 0.00390625, %v634_v54  ;;  %v675_v28 = vmul.f32 0.00390625, %v589_v61 }
 0x15a   : > { %v1386_v29 = vpop.eup %1385  ;;  %1397 = vrsqrt.f32 %v706_v26 }
 0x15b   : > { %v722_v10 = vadd.f32 1e-06, %v690_v56  ;;  %v707_v35 = vadd.f32 1e-06, %v675_v28  ;;  %v768_v38 = vmul.f32 %v1386_v29, %v2589_v34  ;;  %v767_v50 = vmul.f32 %v1386_v29, %v2590_v16  ;;  %v2591_v28 = vld [vmem:[#allocation20_spill] sm:$0xff]  ;;  %v2592_v34 = vld [vmem:[#allocation19_spill] sm:$0xff] }
 0x15c   : > { %v637_v62 = vpop.xlane.xlu1 %636  ;;  %v592_v25 = vpop.xlane.xlu0 %591 }
 0x15d   : > { %1399 = vrsqrt.f32 %v722_v10  ;;  %v691_v39 = vmul.f32 0.00390625, %v637_v62  ;;  %v676_v17 = vmul.f32 0.00390625, %v592_v25  ;;  %934 = vmatprep.mubr.f32.mxu0 %v768_v38 }
 0x15e   : > { %v1388_v11 = vpop.eup %1387  ;;  %1401 = vrsqrt.f32 %v707_v35  ;;  %935 = vmatmul.mubr.f32.vlgmr.msra.gmra.mxu0 %v767_v50 }
 0x15f   : > { %v1390_v55 = vpop.eup %1389  ;;  %v723_v60 = vadd.f32 1e-06, %v691_v39  ;;  %v708_v44 = vadd.f32 1e-06, %v676_v17  ;;  %v800_v26 = vmul.f32 %v1388_v11, %v1985_v4  ;;  %v799_v54 = vmul.f32 %v1388_v11, %v1982_v41 }
 0x160   : > { %v640_v61 = vpop.xlane.xlu1 %639  ;;  %v595_v56 = vpop.xlane.xlu0 %594  ;;  %v770_v29 = vmul.f32 %v1390_v55, %v2591_v28  ;;  %v769_v16 = vmul.f32 %v1390_v55, %v2592_v34 }
 0x161   : > { %1403 = vrsqrt.f32 %v723_v60  ;;  %v692_v10 = vmul.f32 0.00390625, %v640_v61  ;;  %v677_v62 = vmul.f32 0.00390625, %v595_v56  ;;  %1014 = vmatprep.mubr.f32.mxu1 %v800_v26 }
 0x162   : > { %v1392_v38 = vpop.eup %1391  ;;  %1405 = vrsqrt.f32 %v708_v44  ;;  %939 = vmatprep.mubr.f32.mxu0 %v770_v29  ;;  %1015 = vmatmul.mubr.f32.vlgmr.msra.gmra.mxu1 %v799_v54 }
 0x163   : > { %v1394_v35 = vpop.eup %1393  ;;  %v724_v50 = vadd.f32 1e-06, %v692_v10  ;;  %v709_v25 = vadd.f32 1e-06, %v677_v62  ;;  %940 = vmatmul.mubr.f32.gmra.mxu0 %v769_v16  ;;  %v802_v41 = vmul.f32 %v1392_v38, %v1991_v23  ;;  %v801_v4 = vmul.f32 %v1392_v38, %v1988_v59 }
 0x164   : > { %v643_v39 = vpop.xlane.xlu1 %642  ;;  %v598_v17 = vpop.xlane.xlu0 %597  ;;  %v772_v11 = vmul.f32 %v1394_v35, %v2005_v40  ;;  %v771_v55 = vmul.f32 %v1394_v35, %v2002_v9 }
 0x165   : > { %1407 = vrsqrt.f32 %v724_v50  ;;  %v693_v60 = vmul.f32 0.00390625, %v643_v39  ;;  %v678_v26 = vmul.f32 0.00390625, %v598_v17  ;;  %1019 = vmatprep.mubr.f32.mxu1 %v802_v41 }
 0x166   : > { %v1396_v44 = vpop.eup %1395  ;;  %1409 = vrsqrt.f32 %v709_v25  ;;  %944 = vmatprep.mubr.f32.mxu0 %v772_v11  ;;  %1020 = vmatmul.mubr.f32.gmra.mxu1 %v801_v4 }
 0x167   : > { %v1398_v54 = vpop.eup %1397  ;;  %v725_v61 = vadd.f32 1e-06, %v693_v60  ;;  %v710_v56 = vadd.f32 1e-06, %v678_v26  ;;  %945 = vmatmul.mubr.f32.gmra.mxu0 %v771_v55  ;;  %v804_v23 = vmul.f32 %v1396_v44, %v2011_v1  ;;  %v803_v59 = vmul.f32 %v1396_v44, %v2008_v0 }
 0x168   : > { %v646_v28 = vpop.xlane.xlu1 %645  ;;  %v601_v40 = vpop.xlane.xlu0 %600  ;;  %v774_v9 = vmul.f32 %v1398_v54, %v2025_v47  ;;  %v773_v29 = vmul.f32 %v1398_v54, %v2022_v22 }
 0x169   : > { %1411 = vrsqrt.f32 %v725_v61  ;;  %v694_v34 = vmul.f32 0.00390625, %v646_v28  ;;  %v679_v16 = vmul.f32 0.00390625, %v601_v40  ;;  %1024 = vmatprep.mubr.f32.mxu1 %v804_v23 }
 0x16a   : > { %v1400_v10 = vpop.eup %1399  ;;  %1413 = vrsqrt.f32 %v710_v56  ;;  %949 = vmatprep.mubr.f32.mxu0 %v774_v9  ;;  %1025 = vmatmul.mubr.f32.gmra.mxu1 %v803_v59 }
 0x16b   : > { %v1402_v62 = vpop.eup %1401  ;;  %v726_v38 = vadd.f32 1e-06, %v694_v34  ;;  %v711_v35 = vadd.f32 1e-06, %v679_v16  ;;  %950 = vmatmul.mubr.f32.gmra.mxu0 %v773_v29  ;;  %v806_v0 = vmul.f32 %v1400_v10, %v2031_v7  ;;  %v805_v1 = vmul.f32 %v1400_v10, %v2028_v6 }
 0x16c   : > { %v649_v50 = vpop.xlane.xlu1 %648  ;;  %v604_v47 = vpop.xlane.xlu0 %603  ;;  %v776_v22 = vmul.f32 %v1402_v62, %v2046_v13  ;;  %v775_v25 = vmul.f32 %v1402_v62, %v2043_v3 }
 0x16d   : > { %1415 = vrsqrt.f32 %v726_v38  ;;  %v695_v41 = vmul.f32 0.00390625, %v649_v50  ;;  %v680_v4 = vmul.f32 0.00390625, %v604_v47  ;;  %1029 = vmatprep.mubr.f32.mxu1 %v806_v0 }
 0x16e   : > { %v1404_v39 = vpop.eup %1403  ;;  %1417 = vrsqrt.f32 %v711_v35  ;;  %954 = vmatprep.mubr.f32.mxu0 %v776_v22  ;;  %1030 = vmatmul.mubr.f32.gmra.mxu1 %v805_v1 }
 0x16f   : > { %v1406_v17 = vpop.eup %1405  ;;  %v727_v11 = vadd.f32 1e-06, %v695_v41  ;;  %v712_v55 = vadd.f32 1e-06, %v680_v4  ;;  %955 = vmatmul.mubr.f32.gmra.mxu0 %v775_v25  ;;  %v808_v6 = vmul.f32 %v1404_v39, %v2052_v15  ;;  %v807_v7 = vmul.f32 %v1404_v39, %v2049_v14 }
 0x170   : > { %v652_v60 = vpop.xlane.xlu1 %651  ;;  %v607_v13 = vpop.xlane.xlu0 %606  ;;  %v778_v3 = vmul.f32 %v1406_v17, %v2069_v20  ;;  %v777_v26 = vmul.f32 %v1406_v17, %v2066_v52 }
 0x171   : > { %1419 = vrsqrt.f32 %v727_v11  ;;  %v696_v44 = vmul.f32 0.00390625, %v652_v60  ;;  %v681_v54 = vmul.f32 0.00390625, %v607_v13  ;;  %1034 = vmatprep.mubr.f32.mxu1 %v808_v6 }
 0x172   : > { %v1408_v61 = vpop.eup %1407  ;;  %1421 = vrsqrt.f32 %v712_v55  ;;  %959 = vmatprep.mubr.f32.mxu0 %v778_v3  ;;  %1035 = vmatmul.mubr.f32.gmra.mxu1 %v807_v7 }
 0x173   : > { %v1410_v56 = vpop.eup %1409  ;;  %v728_v23 = vadd.f32 1e-06, %v696_v44  ;;  %v713_v59 = vadd.f32 1e-06, %v681_v54  ;;  %960 = vmatmul.mubr.f32.gmra.mxu0 %v777_v26  ;;  %v810_v14 = vmul.f32 %v1408_v61, %v2078_v5  ;;  %v809_v15 = vmul.f32 %v1408_v61, %v2075_v53 }
 0x174   : > { %v655_v28 = vpop.xlane.xlu1 %654  ;;  %v610_v20 = vpop.xlane.xlu0 %609  ;;  %v780_v52 = vmul.f32 %v1410_v56, %v2095_v19  ;;  %v779_v40 = vmul.f32 %v1410_v56, %v2092_v46 }
 0x175   : > { %1423 = vrsqrt.f32 %v728_v23  ;;  %v697_v9 = vmul.f32 0.00390625, %v655_v28  ;;  %v682_v29 = vmul.f32 0.00390625, %v610_v20  ;;  %1039 = vmatprep.mubr.f32.mxu1 %v810_v14 }
 0x176   : > { %v1412_v34 = vpop.eup %1411  ;;  %1425 = vrsqrt.f32 %v713_v59  ;;  %964 = vmatprep.mubr.f32.mxu0 %v780_v52  ;;  %1040 = vmatmul.mubr.f32.gmra.mxu1 %v809_v15 }
 0x177   : > { %v1414_v16 = vpop.eup %1413  ;;  %v729_v10 = vadd.f32 1e-06, %v697_v9  ;;  %v714_v62 = vadd.f32 1e-06, %v682_v29  ;;  %965 = vmatmul.mubr.f32.gmra.mxu0 %v779_v40  ;;  %v812_v53 = vmul.f32 %v1412_v34, %v2102_v58  ;;  %v811_v5 = vmul.f32 %v1412_v34, %v2099_v12 }
 0x178   : > { %v658_v38 = vpop.xlane.xlu1 %657  ;;  %v613_v19 = vpop.xlane.xlu0 %612  ;;  %v782_v46 = vmul.f32 %v1414_v16, %v2119_v33  ;;  %v781_v35 = vmul.f32 %v1414_v16, %v2116_v24 }
 0x179   : > { %1427 = vrsqrt.f32 %v729_v10  ;;  %v698_v0 = vmul.f32 0.00390625, %v658_v38  ;;  %v683_v1 = vmul.f32 0.00390625, %v613_v19  ;;  %1044 = vmatprep.mubr.f32.mxu1 %v812_v53  ;;  %v2595_v19 = vld [vmem:[#allocation22_spill] sm:$0xff] }
 0x17a   : > { %v1416_v50 = vpop.eup %1415  ;;  %1429 = vrsqrt.f32 %v714_v62  ;;  %969 = vmatprep.mubr.f32.mxu0 %v782_v46  ;;  %1045 = vmatmul.mubr.f32.gmra.mxu1 %v811_v5  ;;  %v2594_v5 = vld [vmem:[#allocation23_spill] sm:$0xff] }
 0x17b   : > { %v1418_v47 = vpop.eup %1417  ;;  %v730_v22 = vadd.f32 1e-06, %v698_v0  ;;  %v715_v25 = vadd.f32 1e-06, %v683_v1  ;;  %970 = vmatmul.mubr.f32.gmra.mxu0 %v781_v35  ;;  %v814_v12 = vmul.f32 %v1416_v50, %v2127_v31  ;;  %v813_v58 = vmul.f32 %v1416_v50, %v2124_v2  ;;  %v2596_v35 = vld [vmem:[#allocation25_spill] sm:$0xff]  ;;  %v2597_v1 = vld [vmem:[#allocation24_spill] sm:$0xff] }
 0x17c   : > { %v661_v41 = vpop.xlane.xlu1 %660  ;;  %v616_v33 = vpop.xlane.xlu0 %615  ;;  %v784_v24 = vmul.f32 %v1418_v47, %v2144_v18  ;;  %v783_v4 = vmul.f32 %v1418_v47, %v2141_v30  ;;  %v2598_v47 = vld [vmem:[#allocation6_spill] sm:$0xff] }
 0x17d   : > { %1431 = vrsqrt.f32 %v730_v22  ;;  %v699_v39 = vmul.f32 0.00390625, %v661_v41  ;;  %v684_v17 = vmul.f32 0.00390625, %v616_v33  ;;  %1049 = vmatprep.mubr.f32.mxu1 %v814_v12  ;;  %v2600_v41 = vld [vmem:[#allocation7_spill] sm:$0xff] }
 0x17e   : > { %v1420_v11 = vpop.eup %1419  ;;  %1433 = vrsqrt.f32 %v715_v25  ;;  %974 = vmatprep.mubr.f32.mxu0 %v784_v24  ;;  %1050 = vmatmul.mubr.f32.gmra.mxu1 %v813_v58  ;;  %v2601_v24 = vld [vmem:[#allocation9_spill] sm:$0xff] }
 0x17f   : > { %v1422_v55 = vpop.eup %1421  ;;  %v731_v6 = vadd.f32 1e-06, %v699_v39  ;;  %v716_v7 = vadd.f32 1e-06, %v684_v17  ;;  %975 = vmatmul.mubr.f32.gmra.mxu0 %v783_v4  ;;  %v816_v2 = vmul.f32 %v1420_v11, %v2151_v37  ;;  %v815_v31 = vmul.f32 %v1420_v11, %v2148_v27  ;;  %v2602_v39 = vld [vmem:[#allocation8_spill] sm:$0xff] }
 0x180   : > { %v664_v60 = vpop.xlane.xlu1 %663  ;;  %v619_v18 = vpop.xlane.xlu0 %618  ;;  %v786_v30 = vmul.f32 %v1422_v55, %v2168_v45  ;;  %v785_v13 = vmul.f32 %v1422_v55, %v2165_v36 }
 0x181   : > { %1435 = vrsqrt.f32 %v731_v6  ;;  %v700_v3 = vmul.f32 0.00390625, %v664_v60  ;;  %v685_v26 = vmul.f32 0.00390625, %v619_v18  ;;  %1054 = vmatprep.mubr.f32.mxu1 %v816_v2  ;;  %v2603_v6 = vld [vmem:[#allocation11_spill] sm:$0xff]  ;;  %v2604_v2 = vld [vmem:[#allocation10_spill] sm:$0xff]  ;;  %v2605_v60 = vld [vmem:[#allocation13_spill] sm:$0xff] }
 0x182   : > { %v1424_v44 = vpop.eup %1423  ;;  %1437 = vrsqrt.f32 %v716_v7  ;;  %979 = vmatprep.mubr.f32.mxu0 %v786_v30  ;;  %1055 = vmatmul.mubr.f32.gmra.mxu1 %v815_v31  ;;  %v2606_v18 = vld [vmem:[#allocation12_spill] sm:$0xff] }
 0x183   : > { %v1426_v54 = vpop.eup %1425  ;;  %v732_v61 = vadd.f32 1e-06, %v700_v3  ;;  %v717_v56 = vadd.f32 1e-06, %v685_v26  ;;  %980 = vmatmul.mubr.f32.gmra.mxu0 %v785_v13  ;;  %v818_v27 = vmul.f32 %v1424_v44, %v2176_v43  ;;  %v817_v37 = vmul.f32 %v1424_v44, %v2173_v32  ;;  %v2593_v43 = vld [vmem:[#allocation21_spill] sm:$0xff]  ;;  %v2607_v3 = vld [vmem:[#allocation15_spill] sm:$0xff] }
 0x184   : > { %v667_v23 = vpop.xlane.xlu1 %666  ;;  %v622_v45 = vpop.xlane.xlu0 %621  ;;  %v788_v36 = vmul.f32 %v1426_v54, %v2193_v21  ;;  %v787_v59 = vmul.f32 %v1426_v54, %v2190_v42  ;;  %v2608_v44 = vld [vmem:[#allocation14_spill] sm:$0xff] }
 0x185   : > { %1439 = vrsqrt.f32 %v732_v61  ;;  %v701_v14 = vmul.f32 0.00390625, %v667_v23  ;;  %v686_v15 = vmul.f32 0.00390625, %v622_v45  ;;  %1059 = vmatprep.mubr.f32.mxu1 %v818_v27  ;;  %v2380_v61 = vld [vmem:[%s243_s4] ss:$0 sm:$0xff] }
 0x186   : > { %v1428_v28 = vpop.eup %1427  ;;  %1441 = vrsqrt.f32 %v717_v56  ;;  %984 = vmatprep.mubr.f32.mxu0 %v788_v36  ;;  %1060 = vmatmul.mubr.f32.gmra.mxu1 %v817_v37 }
 0x187   : > { %v1430_v20 = vpop.eup %1429  ;;  %v733_v52 = vadd.f32 1e-06, %v701_v14  ;;  %v718_v40 = vadd.f32 1e-06, %v686_v15  ;;  %985 = vmatmul.mubr.f32.gmra.mxu0 %v787_v59  ;;  %v820_v32 = vmul.f32 %v1428_v28, %v2200_v49  ;;  %v819_v9 = vmul.f32 %v1428_v28, %v2593_v43 }
 0x188   : > { %v670_v29 = vpop.xlane.xlu1 %669  ;;  %v790_v21 = vmul.f32 %v1430_v20, %v2216_v48  ;;  %v789_v42 = vmul.f32 %v1430_v20, %v2213_v8 }
 0x189   : > { %1443 = vrsqrt.f32 %v733_v52  ;;  %v702_v34 = vmul.f32 0.00390625, %v670_v29  ;;  %1064 = vmatprep.mubr.f32.mxu1 %v820_v32 }
 0x18a   : > { %v1432_v16 = vpop.eup %1431  ;;  %1445 = vrsqrt.f32 %v718_v40  ;;  %989 = vmatprep.mubr.f32.mxu0 %v790_v21  ;;  %1065 = vmatmul.mubr.f32.gmra.mxu1 %v819_v9 }
 0x18b   : > { %v1434_v10 = vpop.eup %1433  ;;  %v734_v62 = vadd.f32 1e-06, %v702_v34  ;;  %990 = vmatmul.mubr.f32.gmra.mxu0 %v789_v42  ;;  %v822_v53 = vmul.f32 %v1432_v16, %v2222_v51  ;;  %v821_v49 = vmul.f32 %v1432_v16, %v2219_v57  ;;  %v2599_v51 = vld [vmem:[#allocation5_spill] sm:$0xff] }
 0x18c   : > { %v792_v38 = vmul.f32 %v1434_v10, %v2594_v5  ;;  %v791_v48 = vmul.f32 %v1434_v10, %v2595_v19 }
 0x18d   : > { %1447 = vrsqrt.f32 %v734_v62  ;;  %1069 = vmatprep.mubr.f32.mxu1 %v822_v53 }
 0x18e   : > { %v1436_v8 = vpop.eup %1435  ;;  %994 = vmatprep.mubr.f32.mxu0 %v792_v38  ;;  %1070 = vmatmul.mubr.f32.gmra.mxu1 %v821_v49 }
 0x18f   : > { %v1438_v46 = vpop.eup %1437  ;;  %995 = vmatmul.mubr.f32.gmra.mxu0 %v791_v48  ;;  %v824_v0 = vmul.f32 %v1436_v8, %v2596_v35  ;;  %v823_v50 = vmul.f32 %v1436_v8, %v2597_v1 }
 0x190   : > { %v794_v22 = vmul.f32 %v1438_v46, %v2598_v47  ;;  %v793_v25 = vmul.f32 %v1438_v46, %v2599_v51 }
 0x191   : > { %1074 = vmatprep.mubr.f32.mxu1 %v824_v0 }
 0x192   : > { %v1440_v57 = vpop.eup %1439  ;;  %999 = vmatprep.mubr.f32.mxu0 %v794_v22  ;;  %1075 = vmatmul.mubr.f32.gmra.mxu1 %v823_v50 }
 0x193   : > { %v1442_v12 = vpop.eup %1441  ;;  %1000 = vmatmul.mubr.f32.gmra.mxu0 %v793_v25  ;;  %v826_v58 = vmul.f32 %v1440_v57, %v2262_v63  ;;  %v825_v33 = vmul.f32 %v1440_v57, %v2600_v41 }
 0x194   : > { %v796_v4 = vmul.f32 %v1442_v12, %v2601_v24  ;;  %v795_v17 = vmul.f32 %v1442_v12, %v2602_v39 }
 0x195   : > { %1079 = vmatprep.mubr.f32.mxu1 %v826_v58 }
 0x196   : > { %v1444_v11 = vpop.eup %1443  ;;  %1004 = vmatprep.mubr.f32.mxu0 %v796_v4  ;;  %1080 = vmatmul.mubr.f32.gmra.mxu1 %v825_v33 }
 0x197   : > { %v1446_v55 = vpop.eup %1445  ;;  %1005 = vmatmul.mubr.f32.gmra.mxu0 %v795_v17  ;;  %v828_v7 = vmul.f32 %v1444_v11, %v2603_v6  ;;  %v827_v31 = vmul.f32 %v1444_v11, %v2604_v2 }
 0x198   : > { %v798_v63 = vmul.f32 %v1446_v55, %v2605_v60  ;;  %v797_v30 = vmul.f32 %v1446_v55, %v2606_v18 }
 0x199   : > { %1084 = vmatprep.mubr.f32.mxu1 %v828_v7 }
 0x19a   : > { %v1448_v13 = vpop.eup %1447  ;;  %1009 = vmatprep.mubr.f32.mxu0 %v798_v63  ;;  %1085 = vmatmul.mubr.f32.gmra.mxu1 %v827_v31 }
 0x19b   : > { %1010 = vmatmul.mubr.f32.gmra.mxu0 %v797_v30  ;;  %v830_v26 = vmul.f32 %v1448_v13, %v2607_v3  ;;  %v829_v54 = vmul.f32 %v1448_v13, %v2608_v44 }
 0x19d   : > { %1089 = vmatprep.mubr.f32.mxu1 %v830_v26 }
 0x19e   : > { %1090 = vmatmul.mubr.f32.gmra.mxu1 %v829_v54 }
 0x21e   : > { %v936_v56 = vpop.f32.mrf.mxu0 }
 0x21f   : > { %v937_v27 = vadd.f32 %v2380_v61, %v936_v56 }
 0x220   : > { %v938_v37 = vpop.f32.mrf.mxu0 }
 0x221   : > { %1096 = vst.msk [vmem:[%s2387_s7] sm:$0xff] %vm1095_vm0, %v937_v27 }
 0x222   : > { %v1016_v23 = vpop.f32.mrf.mxu1 }
 0x223   : > { %v941_v45 = vpop.f32.mrf.mxu0  ;;  %v1017_v36 = vadd.f32 %v2380_v61, %v1016_v23 }
 0x224   : > { %v942_v59 = vadd.f32 %v2380_v61, %v941_v45  ;;  %v1018_v14 = vpop.f32.mrf.mxu1 }
 0x225   : > { %1112 = vst.msk [vmem:[%s2387_s7 + $0x80] sm:$0xff] %vm1095_vm0, %v1017_v36  ;;  %v943_v15 = vpop.f32.mrf.mxu0 }
 0x226   : > { %1097 = vst.msk [vmem:[%s2387_s7 + $0x8] sm:$0xff] %vm1095_vm0, %v942_v59  ;;  %v1021_v28 = vpop.f32.mrf.mxu1 }
 0x227   : > { %v946_v20 = vpop.f32.mrf.mxu0  ;;  %v1022_v52 = vadd.f32 %v2380_v61, %v1021_v28 }
 0x228   : > { %v947_v40 = vadd.f32 %v2380_v61, %v946_v20  ;;  %v1023_v32 = vpop.f32.mrf.mxu1 }
 0x229   : > { %1113 = vst.msk [vmem:[%s2387_s7 + $0x88] sm:$0xff] %vm1095_vm0, %v1022_v52  ;;  %v948_v43 = vpop.f32.mrf.mxu0 }
 0x22a   : > { %1098 = vst.msk [vmem:[%s2387_s7 + $0x10] sm:$0xff] %vm1095_vm0, %v947_v40  ;;  %v1026_v9 = vpop.f32.mrf.mxu1 }
 0x22b   : > { %v951_v29 = vpop.f32.mrf.mxu0  ;;  %v1027_v21 = vadd.f32 %v2380_v61, %v1026_v9 }
 0x22c   : > { %v952_v42 = vadd.f32 %v2380_v61, %v951_v29  ;;  %v1028_v34 = vpop.f32.mrf.mxu1 }
 0x22d   : > { %1114 = vst.msk [vmem:[%s2387_s7 + $0x90] sm:$0xff] %vm1095_vm0, %v1027_v21  ;;  %v953_v16 = vpop.f32.mrf.mxu0 }
 0x22e   : > { %1099 = vst.msk [vmem:[%s2387_s7 + $0x18] sm:$0xff] %vm1095_vm0, %v952_v42  ;;  %v1031_v10 = vpop.f32.mrf.mxu1 }
 0x22f   : > { %v956_v62 = vpop.f32.mrf.mxu0  ;;  %v1032_v53 = vadd.f32 %v2380_v61, %v1031_v10 }
 0x230   : > { %v957_v49 = vadd.f32 %v2380_v61, %v956_v62  ;;  %v1033_v5 = vpop.f32.mrf.mxu1 }
 0x231   : > { %1115 = vst.msk [vmem:[%s2387_s7 + $0x98] sm:$0xff] %vm1095_vm0, %v1032_v53  ;;  %v958_v38 = vpop.f32.mrf.mxu0 }
 0x232   : > { %1100 = vst.msk [vmem:[%s2387_s7 + $0x20] sm:$0xff] %vm1095_vm0, %v957_v49  ;;  %v1036_v19 = vpop.f32.mrf.mxu1 }
 0x233   : > { %v961_v48 = vpop.f32.mrf.mxu0  ;;  %v1037_v8 = vadd.f32 %v2380_v61, %v1036_v19 }
 0x234   : > { %v962_v46 = vadd.f32 %v2380_v61, %v961_v48  ;;  %v1038_v35 = vpop.f32.mrf.mxu1 }
 0x235   : > { %1116 = vst.msk [vmem:[%s2387_s7 + $0xa0] sm:$0xff] %vm1095_vm0, %v1037_v8  ;;  %v963_v0 = vpop.f32.mrf.mxu0 }
 0x236   : > { %1101 = vst.msk [vmem:[%s2387_s7 + $0x28] sm:$0xff] %vm1095_vm0, %v962_v46  ;;  %v1041_v1 = vpop.f32.mrf.mxu1 }
 0x237   : > { %v966_v50 = vpop.f32.mrf.mxu0  ;;  %v1042_v47 = vadd.f32 %v2380_v61, %v1041_v1 }
 0x238   : > { %v967_v22 = vadd.f32 %v2380_v61, %v966_v50  ;;  %v1043_v51 = vpop.f32.mrf.mxu1 }
 0x239   : > { %1117 = vst.msk [vmem:[%s2387_s7 + $0xa8] sm:$0xff] %vm1095_vm0, %v1042_v47  ;;  %v968_v25 = vpop.f32.mrf.mxu0 }
 0x23a   : > { %1102 = vst.msk [vmem:[%s2387_s7 + $0x30] sm:$0xff] %vm1095_vm0, %v967_v22  ;;  %v1046_v57 = vpop.f32.mrf.mxu1 }
 0x23b   : > { %v971_v12 = vpop.f32.mrf.mxu0  ;;  %v1047_v58 = vadd.f32 %v2380_v61, %v1046_v57 }
 0x23c   : > { %v972_v41 = vadd.f32 %v2380_v61, %v971_v12  ;;  %v1048_v33 = vpop.f32.mrf.mxu1 }
 0x23d   : > { %1118 = vst.msk [vmem:[%s2387_s7 + $0xb0] sm:$0xff] %vm1095_vm0, %v1047_v58  ;;  %v973_v24 = vpop.f32.mrf.mxu0 }
 0x23e   : > { %1103 = vst.msk [vmem:[%s2387_s7 + $0x38] sm:$0xff] %vm1095_vm0, %v972_v41  ;;  %v1051_v4 = vpop.f32.mrf.mxu1 }
 0x23f   : > { %v976_v39 = vpop.f32.mrf.mxu0  ;;  %v1052_v17 = vadd.f32 %v2380_v61, %v1051_v4 }
 0x240   : > { %v977_v11 = vadd.f32 %v2380_v61, %v976_v39  ;;  %v1053_v55 = vpop.f32.mrf.mxu1 }
 0x241   : > { %1119 = vst.msk [vmem:[%s2387_s7 + $0xb8] sm:$0xff] %vm1095_vm0, %v1052_v17  ;;  %v978_v6 = vpop.f32.mrf.mxu0 }
 0x242   : > { %1104 = vst.msk [vmem:[%s2387_s7 + $0x40] sm:$0xff] %vm1095_vm0, %v977_v11  ;;  %v1056_v7 = vpop.f32.mrf.mxu1 }
 0x243   : > { %v981_v2 = vpop.f32.mrf.mxu0  ;;  %v1057_v31 = vadd.f32 %v2380_v61, %v1056_v7 }
 0x244   : > { %v982_v60 = vadd.f32 %v2380_v61, %v981_v2  ;;  %v1058_v63 = vpop.f32.mrf.mxu1 }
 0x245   : > { %1120 = vst.msk [vmem:[%s2387_s7 + $0xc0] sm:$0xff] %vm1095_vm0, %v1057_v31  ;;  %v983_v18 = vpop.f32.mrf.mxu0 }
 0x246   : > { %1105 = vst.msk [vmem:[%s2387_s7 + $0x48] sm:$0xff] %vm1095_vm0, %v982_v60  ;;  %v1061_v30 = vpop.f32.mrf.mxu1 }
 0x247   : > { %v986_v13 = vpop.f32.mrf.mxu0  ;;  %v1062_v3 = vadd.f32 %v2380_v61, %v1061_v30 }
 0x248   : > { %v987_v26 = vadd.f32 %v2380_v61, %v986_v13  ;;  %v1063_v44 = vpop.f32.mrf.mxu1 }
 0x249   : > { %1121 = vst.msk [vmem:[%s2387_s7 + $0xc8] sm:$0xff] %vm1095_vm0, %v1062_v3  ;;  %v988_v54 = vpop.f32.mrf.mxu0 }
 0x24a   : > { %1106 = vst.msk [vmem:[%s2387_s7 + $0x50] sm:$0xff] %vm1095_vm0, %v987_v26  ;;  %v1066_v56 = vpop.f32.mrf.mxu1 }
 0x24b   : > { %v991_v27 = vpop.f32.mrf.mxu0  ;;  %v1067_v37 = vadd.f32 %v2380_v61, %v1066_v56 }
 0x24c   : > { %v992_v23 = vadd.f32 %v2380_v61, %v991_v27  ;;  %v1068_v45 = vpop.f32.mrf.mxu1 }
 0x24d   : > { %1122 = vst.msk [vmem:[%s2387_s7 + $0xd0] sm:$0xff] %vm1095_vm0, %v1067_v37  ;;  %v993_v36 = vpop.f32.mrf.mxu0 }
 0x24e   : > { %1107 = vst.msk [vmem:[%s2387_s7 + $0x58] sm:$0xff] %vm1095_vm0, %v992_v23  ;;  %v1071_v59 = vpop.f32.mrf.mxu1 }
 0x24f   : > { %v996_v14 = vpop.f32.mrf.mxu0  ;;  %v1072_v15 = vadd.f32 %v2380_v61, %v1071_v59 }
 0x250   : > { %v997_v28 = vadd.f32 %v2380_v61, %v996_v14  ;;  %v1073_v20 = vpop.f32.mrf.mxu1 }
 0x251   : > { %1123 = vst.msk [vmem:[%s2387_s7 + $0xd8] sm:$0xff] %vm1095_vm0, %v1072_v15  ;;  %v998_v52 = vpop.f32.mrf.mxu0 }
 0x252   : > { %1108 = vst.msk [vmem:[%s2387_s7 + $0x60] sm:$0xff] %vm1095_vm0, %v997_v28  ;;  %v1076_v40 = vpop.f32.mrf.mxu1 }
 0x253   : > { %v1001_v32 = vpop.f32.mrf.mxu0  ;;  %v1077_v43 = vadd.f32 %v2380_v61, %v1076_v40 }
 0x254   : > { %v1002_v9 = vadd.f32 %v2380_v61, %v1001_v32  ;;  %v1078_v29 = vpop.f32.mrf.mxu1 }
 0x255   : > { %1124 = vst.msk [vmem:[%s2387_s7 + $0xe0] sm:$0xff] %vm1095_vm0, %v1077_v43  ;;  %v1003_v21 = vpop.f32.mrf.mxu0 }
 0x256   : > { %1109 = vst.msk [vmem:[%s2387_s7 + $0x68] sm:$0xff] %vm1095_vm0, %v1002_v9  ;;  %v1081_v42 = vpop.f32.mrf.mxu1 }
 0x257   : > { %v1006_v34 = vpop.f32.mrf.mxu0  ;;  %v1082_v16 = vadd.f32 %v2380_v61, %v1081_v42 }
 0x258   : > { %v1007_v10 = vadd.f32 %v2380_v61, %v1006_v34  ;;  %v1083_v62 = vpop.f32.mrf.mxu1 }
 0x259   : > { %1125 = vst.msk [vmem:[%s2387_s7 + $0xe8] sm:$0xff] %vm1095_vm0, %v1082_v16  ;;  %v1008_v53 = vpop.f32.mrf.mxu0 }
 0x25a   : > { %1110 = vst.msk [vmem:[%s2387_s7 + $0x70] sm:$0xff] %vm1095_vm0, %v1007_v10  ;;  %v1086_v49 = vpop.f32.mrf.mxu1 }
 0x25b   : > { %v1011_v5 = vpop.f32.mrf.mxu0  ;;  %v1087_v38 = vadd.f32 %v2380_v61, %v1086_v49 }
 0x25c   : > { %v1012_v19 = vadd.f32 %v2380_v61, %v1011_v5  ;;  %v1088_v48 = vpop.f32.mrf.mxu1 }
 0x25d   : > { %1126 = vst.msk [vmem:[%s2387_s7 + $0xf0] sm:$0xff] %vm1095_vm0, %v1087_v38  ;;  %v1013_v8 = vpop.f32.mrf.mxu0 }
 0x25e   : > { %1111 = vst.msk [vmem:[%s2387_s7 + $0x78] sm:$0xff] %vm1095_vm0, %v1012_v19  ;;  %v1091_v46 = vpop.f32.mrf.mxu1 }
 0x25f   : > { %v1092_v35 = vadd.f32 %v2380_v61, %v1091_v46 }
 0x260   : > { %v1093_v0 = vpop.f32.mrf.mxu1 }
 0x261   : > { %1127 = vst.msk [vmem:[%s2387_s7 + $0xf8] sm:$0xff] %vm1095_vm0, %v1092_v35 }
 0x262 PF: > { %s16_s17 = sadd.s32 1, %s1527_s17   ;;  %s2609_s12 = smov %s1511_s13 }
 0x263   : > { %p13_p8 = scmp.ge.s32.totalorder %s16_s17, 4   ;;  %s2610_s13 = smov %s1515_s14 }
 0x264   : > { %s2611_s14 = smov %s1602_s24  ;;  %s2612_s15 = smov %s1523_s16 }
 0x265   : > { %s2613_s16 = smov %s2615_s19  ;;  %15 = sbr.rel (!%p13_p8) target bundleno = 4 (0x4), region = 78 }
 0x26a   :  { %1158 = vsyncpa [#allocation3], 1 }
 0x26b   :  { %1160 = vsyncpa [#allocation3 + $0x1], 1 }

</bundles_post_ra>
